<compile_context>
chip_gen: v5e
topology: v5e:2x2
jax: 0.10.0
libtpu: 0.0.40
codegen_flags: <defaults>
</compile_context>

<pallas_src>
import functools

import jax
import jax.numpy as jnp
from jax import lax
from jax.experimental import pallas as pl
from jax.experimental.pallas import tpu as pltpu


def _lka_kernel(x_ref, hh_ref, ww_ref, w0_ref, b0_ref, w1_ref, b1_ref,
                wc_ref, bp_ref, o_ref, *, H, W):
    # x_ref: (1, C, H*W) f32 -- channels on sublanes, flattened spatial on lanes.
    C = x_ref.shape[1]
    HW = H * W
    x = x_ref[0]                       # (C, HW)
    hh = hh_ref[...]                   # (C, HW) int32: row index h of each lane
    ww = ww_ref[...]                   # (C, HW) int32: col index w of each lane

    def tap(val, dh, dw):
        # out[:, h*W + w] = val[:, (h+dh)*W + (w+dw)] if inside the image else 0
        # (zero padding).  Shift on the flattened axis via an XLU roll, then mask
        # the rows/cols that fell off the image (also kills row-wrap artifacts).
        s = dh * W + dw
        if s % HW:
            # roll(v, r)[p] == v[(p - r) % HW]  ->  r = (-s) % HW yields v[p + s].
            val = pltpu.roll(val, shift=(-s) % HW, axis=1)
        conds = []
        if dh < 0:
            conds.append(hh >= -dh)
        elif dh > 0:
            conds.append(hh < H - dh)
        if dw < 0:
            conds.append(ww >= -dw)
        elif dw > 0:
            conds.append(ww < W - dw)
        if not conds:
            return val
        valid = conds[0]
        for c in conds[1:]:
            valid = valid & c
        return jnp.where(valid, val, 0.0)

    # ---------- conv0: depthwise 3x3, padding=1 ----------
    acc = jnp.zeros((C, HW), jnp.float32)
    for kh in range(3):
        for kw in range(3):
            acc = acc + tap(x, kh - 1, kw - 1) * w0_ref[kh * 3 + kw]   # (C,1) bcast
    acc = acc + b0_ref[...]

    # ---------- conv_spatial: depthwise 5x5, dilation=3, padding=6 ----------
    acc2 = jnp.zeros((C, HW), jnp.float32)
    for kh in range(5):
        for kw in range(5):
            acc2 = acc2 + tap(acc, 3 * (kh - 2), 3 * (kw - 2)) * w1_ref[kh * 5 + kw]
    acc2 = acc2 + b1_ref[...]

    # ---------- conv1: pointwise 1x1 channel mixing ----------
    # C == 4 << 128: unrolled VPU broadcast-FMAs instead of a near-empty MXU pass.
    mix = jnp.zeros((C, HW), jnp.float32)
    for ci in range(C):
        mix = mix + wc_ref[ci] * acc2[ci:ci + 1, :]   # (C,1)*(1,HW) -> (C,HW)
    attn = mix + bp_ref[...]

    # ---------- gate: u * attn (single lane-dense store) ----------
    o_ref[0] = x * attn


def lka_pallas(x_nhwc, w0, b0, w1, b1, wp, bp):
    """x_nhwc: (N, H, W, C) f32.
    w0: (3,3,C) depthwise; w1: (5,5,C) depthwise; wp: (C_out, C_in) 1x1 conv."""
    N, H, W, C = x_nhwc.shape
    HW = H * W

    # Glue: NHWC -> (N, C, H*W) so the trailing (lane) dim is H*W >= 128.
    x_flat = jnp.transpose(x_nhwc, (0, 3, 1, 2)).reshape(N, C, HW)

    # Depthwise weights: one (C, 1) per-channel column per tap.
    w0_k = w0.reshape(9, C)[:, :, None]
    w1_k = w1.reshape(25, C)[:, :, None]
    b0_k = b0.reshape(C, 1)
    b1_k = b1.reshape(C, 1)
    # 1x1 weights: wc[ci, co, 0] = wp[co, ci]  (one output column per input ch).
    wc_k = jnp.transpose(wp)[:, :, None]
    bp_k = bp.reshape(C, 1)

    # Per-lane (h, w) coordinates for the in-kernel edge masks.
    p = jnp.arange(HW, dtype=jnp.int32)
    hh_map = jnp.broadcast_to((p // W)[None, :], (C, HW))
    ww_map = jnp.broadcast_to((p % W)[None, :], (C, HW))

    grid_spec = pltpu.PrefetchScalarGridSpec(
        num_scalar_prefetch=0,
        grid=(N,),
        in_specs=[
            pl.BlockSpec((1, C, HW), lambda n: (n, 0, 0)),   # x
            pl.BlockSpec((C, HW), lambda n: (0, 0)),         # hh map
            pl.BlockSpec((C, HW), lambda n: (0, 0)),         # ww map
            pl.BlockSpec((9, C, 1), lambda n: (0, 0, 0)),    # conv0 depthwise w
            pl.BlockSpec((C, 1), lambda n: (0, 0)),          # conv0 bias
            pl.BlockSpec((25, C, 1), lambda n: (0, 0, 0)),   # conv_spatial w
            pl.BlockSpec((C, 1), lambda n: (0, 0)),          # conv_spatial bias
            pl.BlockSpec((C, C, 1), lambda n: (0, 0, 0)),    # conv1 weight cols
            pl.BlockSpec((C, 1), lambda n: (0, 0)),          # conv1 bias
        ],
        out_specs=pl.BlockSpec((1, C, HW), lambda n: (n, 0, 0)),
    )
    out_flat = pl.pallas_call(
        functools.partial(_lka_kernel, H=H, W=W),
        out_shape=jax.ShapeDtypeStruct((N, C, HW), jnp.float32),
        grid_spec=grid_spec,
        compiler_params=pltpu.CompilerParams(
            dimension_semantics=("parallel",)),    # v7x: shard batch over 2 TCs
    )(x_flat, hh_map, ww_map, w0_k, b0_k, w1_k, b1_k, wc_k, bp_k)

    # (N, C, H*W) -> NHWC.
    return jnp.transpose(out_flat.reshape(N, C, H, W), (0, 2, 3, 1))


def lka_reference(x, w0, b0, w1, b1, wp, bp):
    """Pure-JAX reference (NHWC) matching the PyTorch semantics."""
    C = x.shape[-1]
    dn = ('NHWC', 'HWIO', 'NHWC')
    hi = lax.Precision.HIGHEST
    a = lax.conv_general_dilated(x, w0.reshape(3, 3, 1, C), (1, 1), [(1, 1), (1, 1)],
                                 dimension_numbers=dn, feature_group_count=C,
                                 precision=hi) + b0
    a = lax.conv_general_dilated(a, w1.reshape(5, 5, 1, C), (1, 1), [(6, 6), (6, 6)],
                                 rhs_dilation=(3, 3), dimension_numbers=dn,
                                 feature_group_count=C, precision=hi) + b1
    a = lax.conv_general_dilated(a, jnp.transpose(wp).reshape(1, 1, C, C), (1, 1),
                                 [(0, 0), (0, 0)], dimension_numbers=dn,
                                 precision=hi) + bp
    return x * a


if __name__ == "__main__":
    dim, N, H, W = 4, 2, 16, 16
    key = jax.random.PRNGKey(0)
    k = jax.random.split(key, 7)

    # Deterministic synthetic parameters (shapes follow nn.Conv2d in __init__):
    #   conv0.weight (dim,1,3,3)        -> stored here as (3,3,dim) = w0[kh,kw,c]
    #   conv_spatial.weight (dim,1,5,5) -> stored here as (5,5,dim)
    #   conv1.weight (dim,dim,1,1)      -> stored here as (dim,dim) = wp[out,in]
    x_nchw = jax.random.normal(k[0], (N, dim, H, W), jnp.float32)
    w0 = 0.3 * jax.random.normal(k[1], (3, 3, dim), jnp.float32)
    b0 = 0.1 * jax.random.normal(k[2], (dim,), jnp.float32)
    w1 = 0.2 * jax.random.normal(k[3], (5, 5, dim), jnp.float32)
    b1 = 0.1 * jax.random.normal(k[4], (dim,), jnp.float32)
    wp = 0.3 * jax.random.normal(k[5], (dim, dim), jnp.float32)
    bp = 0.1 * jax.random.normal(k[6], (dim,), jnp.float32)

    # NCHW (PyTorch) -> NHWC; `u = x.clone()` is implicit in functional JAX.
    x_nhwc = jnp.transpose(x_nchw, (0, 2, 3, 1))

    out = lka_pallas(x_nhwc, w0, b0, w1, b1, wp, bp)
    out = jax.block_until_ready(out)

    ref = lka_reference(x_nhwc, w0, b0, w1, b1, wp, bp)
    assert out.shape == (N, H, W, dim)
    max_err = float(jnp.max(jnp.abs(out - ref)))
    # Pure-f32 path: keep the tolerance tight.
    assert bool(jnp.allclose(out, ref, rtol=1e-5, atol=1e-4)), f"max abs err {max_err}"

    print("KERNEL_OK")
</pallas_src>

<mosaic_0001>
module attributes {stable_mosaic.version = 11 : i64} {
  func.func @_lka_kernel(%arg0: i32, %arg1: memref<1x4x256xf32, #tpu.memory_space<vmem>>, %arg2: memref<4x256xi32, #tpu.memory_space<vmem>>, %arg3: memref<4x256xi32, #tpu.memory_space<vmem>>, %arg4: memref<9x4x1xf32, #tpu.memory_space<vmem>>, %arg5: memref<4x1xf32, #tpu.memory_space<vmem>>, %arg6: memref<25x4x1xf32, #tpu.memory_space<vmem>>, %arg7: memref<4x1xf32, #tpu.memory_space<vmem>>, %arg8: memref<4x4x1xf32, #tpu.memory_space<vmem>>, %arg9: memref<4x1xf32, #tpu.memory_space<vmem>>, %arg10: memref<1x4x256xf32, #tpu.memory_space<vmem>>) attributes {dimension_semantics = [#tpu.dimension_semantics<parallel>], iteration_bounds = array<i64: 2>, scalar_prefetch = 0 : i64, scratch_operands = 0 : i64, tpu.core_type = #tpu.core_type<tc>, window_params = [{transform_indices = @transform_0, window_bounds = array<i64: 1, 4, 256>}, {pipeline_mode = #tpu.pipeline_mode<synchronous>, transform_indices = @transform_1, window_bounds = array<i64: 4, 256>}, {pipeline_mode = #tpu.pipeline_mode<synchronous>, transform_indices = @transform_2, window_bounds = array<i64: 4, 256>}, {pipeline_mode = #tpu.pipeline_mode<synchronous>, transform_indices = @transform_3, window_bounds = array<i64: 9, 4, 1>}, {pipeline_mode = #tpu.pipeline_mode<synchronous>, transform_indices = @transform_4, window_bounds = array<i64: 4, 1>}, {pipeline_mode = #tpu.pipeline_mode<synchronous>, transform_indices = @transform_5, window_bounds = array<i64: 25, 4, 1>}, {pipeline_mode = #tpu.pipeline_mode<synchronous>, transform_indices = @transform_6, window_bounds = array<i64: 4, 1>}, {pipeline_mode = #tpu.pipeline_mode<synchronous>, transform_indices = @transform_7, window_bounds = array<i64: 4, 4, 1>}, {pipeline_mode = #tpu.pipeline_mode<synchronous>, transform_indices = @transform_8, window_bounds = array<i64: 4, 1>}, {transform_indices = @transform_9, window_bounds = array<i64: 1, 4, 256>}]} {
    %c0 = arith.constant 0 : index
    %c0_0 = arith.constant 0 : index
    %c0_1 = arith.constant 0 : index
    %0 = vector.load %arg1[%c0, %c0_0, %c0_1] : memref<1x4x256xf32, #tpu.memory_space<vmem>>, vector<1x4x256xf32>
    %1 = vector.shape_cast %0 : vector<1x4x256xf32> to vector<4x256xf32>
    %c0_2 = arith.constant 0 : index
    %c0_3 = arith.constant 0 : index
    %2 = vector.load %arg2[%c0_2, %c0_3] : memref<4x256xi32, #tpu.memory_space<vmem>>, vector<4x256xi32>
    %c0_4 = arith.constant 0 : index
    %c0_5 = arith.constant 0 : index
    %3 = vector.load %arg3[%c0_4, %c0_5] : memref<4x256xi32, #tpu.memory_space<vmem>>, vector<4x256xi32>
    %cst = arith.constant 0.000000e+00 : f32
    %4 = vector.broadcast %cst : f32 to vector<4x256xf32>
    %c17_i32 = arith.constant 17 : i32
    %5 = tpu.dynamic_rotate %1 by %c17_i32 dim 1 : vector<4x256xf32>, i32 -> vector<4x256xf32>
    %c1_i32 = arith.constant 1 : i32
    %6 = vector.broadcast %c1_i32 : i32 to vector<4x256xi32>
    %7 = arith.cmpi sge, %2, %6 : vector<4x256xi32>
    %c1_i32_6 = arith.constant 1 : i32
    %8 = vector.broadcast %c1_i32_6 : i32 to vector<4x256xi32>
    %9 = arith.cmpi sge, %3, %8 : vector<4x256xi32>
    %10 = arith.andi %7, %9 : vector<4x256xi1>
    %cst_7 = arith.constant 0.000000e+00 : f32
    %11 = vector.broadcast %cst_7 : f32 to vector<4x256xf32>
    %12 = arith.select %10, %5, %11 : vector<4x256xi1>, vector<4x256xf32>
    %c0_8 = arith.constant 0 : index
    %c0_9 = arith.constant 0 : index
    %c0_10 = arith.constant 0 : index
    %13 = vector.load %arg4[%c0_8, %c0_9, %c0_10] : memref<9x4x1xf32, #tpu.memory_space<vmem>>, vector<1x4x1xf32>
    %14 = vector.shape_cast %13 : vector<1x4x1xf32> to vector<4x1xf32>
    %15 = vector.broadcast %14 : vector<4x1xf32> to vector<4x256xf32>
    %16 = arith.mulf %12, %15 : vector<4x256xf32>
    %17 = arith.addf %4, %16 : vector<4x256xf32>
    %c16_i32 = arith.constant 16 : i32
    %18 = tpu.dynamic_rotate %1 by %c16_i32 dim 1 : vector<4x256xf32>, i32 -> vector<4x256xf32>
    %c1_i32_11 = arith.constant 1 : i32
    %19 = vector.broadcast %c1_i32_11 : i32 to vector<4x256xi32>
    %20 = arith.cmpi sge, %2, %19 : vector<4x256xi32>
    %cst_12 = arith.constant 0.000000e+00 : f32
    %21 = vector.broadcast %cst_12 : f32 to vector<4x256xf32>
    %22 = arith.select %20, %18, %21 : vector<4x256xi1>, vector<4x256xf32>
    %c1 = arith.constant 1 : index
    %c0_13 = arith.constant 0 : index
    %c0_14 = arith.constant 0 : index
    %23 = vector.load %arg4[%c1, %c0_13, %c0_14] : memref<9x4x1xf32, #tpu.memory_space<vmem>>, vector<1x4x1xf32>
    %24 = vector.shape_cast %23 : vector<1x4x1xf32> to vector<4x1xf32>
    %25 = vector.broadcast %24 : vector<4x1xf32> to vector<4x256xf32>
    %26 = arith.mulf %22, %25 : vector<4x256xf32>
    %27 = arith.addf %17, %26 : vector<4x256xf32>
    %c15_i32 = arith.constant 15 : i32
    %28 = tpu.dynamic_rotate %1 by %c15_i32 dim 1 : vector<4x256xf32>, i32 -> vector<4x256xf32>
    %c1_i32_15 = arith.constant 1 : i32
    %29 = vector.broadcast %c1_i32_15 : i32 to vector<4x256xi32>
    %30 = arith.cmpi sge, %2, %29 : vector<4x256xi32>
    %c15_i32_16 = arith.constant 15 : i32
    %31 = vector.broadcast %c15_i32_16 : i32 to vector<4x256xi32>
    %32 = arith.cmpi slt, %3, %31 : vector<4x256xi32>
    %33 = arith.andi %30, %32 : vector<4x256xi1>
    %cst_17 = arith.constant 0.000000e+00 : f32
    %34 = vector.broadcast %cst_17 : f32 to vector<4x256xf32>
    %35 = arith.select %33, %28, %34 : vector<4x256xi1>, vector<4x256xf32>
    %c2 = arith.constant 2 : index
    %c0_18 = arith.constant 0 : index
    %c0_19 = arith.constant 0 : index
    %36 = vector.load %arg4[%c2, %c0_18, %c0_19] : memref<9x4x1xf32, #tpu.memory_space<vmem>>, vector<1x4x1xf32>
    %37 = vector.shape_cast %36 : vector<1x4x1xf32> to vector<4x1xf32>
    %38 = vector.broadcast %37 : vector<4x1xf32> to vector<4x256xf32>
    %39 = arith.mulf %35, %38 : vector<4x256xf32>
    %40 = arith.addf %27, %39 : vector<4x256xf32>
    %c1_i32_20 = arith.constant 1 : i32
    %41 = tpu.dynamic_rotate %1 by %c1_i32_20 dim 1 : vector<4x256xf32>, i32 -> vector<4x256xf32>
    %c1_i32_21 = arith.constant 1 : i32
    %42 = vector.broadcast %c1_i32_21 : i32 to vector<4x256xi32>
    %43 = arith.cmpi sge, %3, %42 : vector<4x256xi32>
    %cst_22 = arith.constant 0.000000e+00 : f32
    %44 = vector.broadcast %cst_22 : f32 to vector<4x256xf32>
    %45 = arith.select %43, %41, %44 : vector<4x256xi1>, vector<4x256xf32>
    %c3 = arith.constant 3 : index
    %c0_23 = arith.constant 0 : index
    %c0_24 = arith.constant 0 : index
    %46 = vector.load %arg4[%c3, %c0_23, %c0_24] : memref<9x4x1xf32, #tpu.memory_space<vmem>>, vector<1x4x1xf32>
    %47 = vector.shape_cast %46 : vector<1x4x1xf32> to vector<4x1xf32>
    %48 = vector.broadcast %47 : vector<4x1xf32> to vector<4x256xf32>
    %49 = arith.mulf %45, %48 : vector<4x256xf32>
    %50 = arith.addf %40, %49 : vector<4x256xf32>
    %c4 = arith.constant 4 : index
    %c0_25 = arith.constant 0 : index
    %c0_26 = arith.constant 0 : index
    %51 = vector.load %arg4[%c4, %c0_25, %c0_26] : memref<9x4x1xf32, #tpu.memory_space<vmem>>, vector<1x4x1xf32>
    %52 = vector.shape_cast %51 : vector<1x4x1xf32> to vector<4x1xf32>
    %53 = vector.broadcast %52 : vector<4x1xf32> to vector<4x256xf32>
    %54 = arith.mulf %1, %53 : vector<4x256xf32>
    %55 = arith.addf %50, %54 : vector<4x256xf32>
    %c255_i32 = arith.constant 255 : i32
    %56 = tpu.dynamic_rotate %1 by %c255_i32 dim 1 : vector<4x256xf32>, i32 -> vector<4x256xf32>
    %c15_i32_27 = arith.constant 15 : i32
    %57 = vector.broadcast %c15_i32_27 : i32 to vector<4x256xi32>
    %58 = arith.cmpi slt, %3, %57 : vector<4x256xi32>
    %cst_28 = arith.constant 0.000000e+00 : f32
    %59 = vector.broadcast %cst_28 : f32 to vector<4x256xf32>
    %60 = arith.select %58, %56, %59 : vector<4x256xi1>, vector<4x256xf32>
    %c5 = arith.constant 5 : index
    %c0_29 = arith.constant 0 : index
    %c0_30 = arith.constant 0 : index
    %61 = vector.load %arg4[%c5, %c0_29, %c0_30] : memref<9x4x1xf32, #tpu.memory_space<vmem>>, vector<1x4x1xf32>
    %62 = vector.shape_cast %61 : vector<1x4x1xf32> to vector<4x1xf32>
    %63 = vector.broadcast %62 : vector<4x1xf32> to vector<4x256xf32>
    %64 = arith.mulf %60, %63 : vector<4x256xf32>
    %65 = arith.addf %55, %64 : vector<4x256xf32>
    %c241_i32 = arith.constant 241 : i32
    %66 = tpu.dynamic_rotate %1 by %c241_i32 dim 1 : vector<4x256xf32>, i32 -> vector<4x256xf32>
    %c15_i32_31 = arith.constant 15 : i32
    %67 = vector.broadcast %c15_i32_31 : i32 to vector<4x256xi32>
    %68 = arith.cmpi slt, %2, %67 : vector<4x256xi32>
    %c1_i32_32 = arith.constant 1 : i32
    %69 = vector.broadcast %c1_i32_32 : i32 to vector<4x256xi32>
    %70 = arith.cmpi sge, %3, %69 : vector<4x256xi32>
    %71 = arith.andi %68, %70 : vector<4x256xi1>
    %cst_33 = arith.constant 0.000000e+00 : f32
    %72 = vector.broadcast %cst_33 : f32 to vector<4x256xf32>
    %73 = arith.select %71, %66, %72 : vector<4x256xi1>, vector<4x256xf32>
    %c6 = arith.constant 6 : index
    %c0_34 = arith.constant 0 : index
    %c0_35 = arith.constant 0 : index
    %74 = vector.load %arg4[%c6, %c0_34, %c0_35] : memref<9x4x1xf32, #tpu.memory_space<vmem>>, vector<1x4x1xf32>
    %75 = vector.shape_cast %74 : vector<1x4x1xf32> to vector<4x1xf32>
    %76 = vector.broadcast %75 : vector<4x1xf32> to vector<4x256xf32>
    %77 = arith.mulf %73, %76 : vector<4x256xf32>
    %78 = arith.addf %65, %77 : vector<4x256xf32>
    %c240_i32 = arith.constant 240 : i32
    %79 = tpu.dynamic_rotate %1 by %c240_i32 dim 1 : vector<4x256xf32>, i32 -> vector<4x256xf32>
    %c15_i32_36 = arith.constant 15 : i32
    %80 = vector.broadcast %c15_i32_36 : i32 to vector<4x256xi32>
    %81 = arith.cmpi slt, %2, %80 : vector<4x256xi32>
    %cst_37 = arith.constant 0.000000e+00 : f32
    %82 = vector.broadcast %cst_37 : f32 to vector<4x256xf32>
    %83 = arith.select %81, %79, %82 : vector<4x256xi1>, vector<4x256xf32>
    %c7 = arith.constant 7 : index
    %c0_38 = arith.constant 0 : index
    %c0_39 = arith.constant 0 : index
    %84 = vector.load %arg4[%c7, %c0_38, %c0_39] : memref<9x4x1xf32, #tpu.memory_space<vmem>>, vector<1x4x1xf32>
    %85 = vector.shape_cast %84 : vector<1x4x1xf32> to vector<4x1xf32>
    %86 = vector.broadcast %85 : vector<4x1xf32> to vector<4x256xf32>
    %87 = arith.mulf %83, %86 : vector<4x256xf32>
    %88 = arith.addf %78, %87 : vector<4x256xf32>
    %c239_i32 = arith.constant 239 : i32
    %89 = tpu.dynamic_rotate %1 by %c239_i32 dim 1 : vector<4x256xf32>, i32 -> vector<4x256xf32>
    %c15_i32_40 = arith.constant 15 : i32
    %90 = vector.broadcast %c15_i32_40 : i32 to vector<4x256xi32>
    %91 = arith.cmpi slt, %2, %90 : vector<4x256xi32>
    %c15_i32_41 = arith.constant 15 : i32
    %92 = vector.broadcast %c15_i32_41 : i32 to vector<4x256xi32>
    %93 = arith.cmpi slt, %3, %92 : vector<4x256xi32>
    %94 = arith.andi %91, %93 : vector<4x256xi1>
    %cst_42 = arith.constant 0.000000e+00 : f32
    %95 = vector.broadcast %cst_42 : f32 to vector<4x256xf32>
    %96 = arith.select %94, %89, %95 : vector<4x256xi1>, vector<4x256xf32>
    %c8 = arith.constant 8 : index
    %c0_43 = arith.constant 0 : index
    %c0_44 = arith.constant 0 : index
    %97 = vector.load %arg4[%c8, %c0_43, %c0_44] : memref<9x4x1xf32, #tpu.memory_space<vmem>>, vector<1x4x1xf32>
    %98 = vector.shape_cast %97 : vector<1x4x1xf32> to vector<4x1xf32>
    %99 = vector.broadcast %98 : vector<4x1xf32> to vector<4x256xf32>
    %100 = arith.mulf %96, %99 : vector<4x256xf32>
    %101 = arith.addf %88, %100 : vector<4x256xf32>
    %c0_45 = arith.constant 0 : index
    %c0_46 = arith.constant 0 : index
    %102 = vector.load %arg5[%c0_45, %c0_46] : memref<4x1xf32, #tpu.memory_space<vmem>>, vector<4x1xf32>
    %103 = vector.broadcast %102 : vector<4x1xf32> to vector<4x256xf32>
    %104 = arith.addf %101, %103 : vector<4x256xf32>
    %cst_47 = arith.constant 0.000000e+00 : f32
    %105 = vector.broadcast %cst_47 : f32 to vector<4x256xf32>
    %c102_i32 = arith.constant 102 : i32
    %106 = tpu.dynamic_rotate %104 by %c102_i32 dim 1 : vector<4x256xf32>, i32 -> vector<4x256xf32>
    %c6_i32 = arith.constant 6 : i32
    %107 = vector.broadcast %c6_i32 : i32 to vector<4x256xi32>
    %108 = arith.cmpi sge, %2, %107 : vector<4x256xi32>
    %c6_i32_48 = arith.constant 6 : i32
    %109 = vector.broadcast %c6_i32_48 : i32 to vector<4x256xi32>
    %110 = arith.cmpi sge, %3, %109 : vector<4x256xi32>
    %111 = arith.andi %108, %110 : vector<4x256xi1>
    %cst_49 = arith.constant 0.000000e+00 : f32
    %112 = vector.broadcast %cst_49 : f32 to vector<4x256xf32>
    %113 = arith.select %111, %106, %112 : vector<4x256xi1>, vector<4x256xf32>
    %c0_50 = arith.constant 0 : index
    %c0_51 = arith.constant 0 : index
    %c0_52 = arith.constant 0 : index
    %114 = vector.load %arg6[%c0_50, %c0_51, %c0_52] : memref<25x4x1xf32, #tpu.memory_space<vmem>>, vector<1x4x1xf32>
    %115 = vector.shape_cast %114 : vector<1x4x1xf32> to vector<4x1xf32>
    %116 = vector.broadcast %115 : vector<4x1xf32> to vector<4x256xf32>
    %117 = arith.mulf %113, %116 : vector<4x256xf32>
    %118 = arith.addf %105, %117 : vector<4x256xf32>
    %c99_i32 = arith.constant 99 : i32
    %119 = tpu.dynamic_rotate %104 by %c99_i32 dim 1 : vector<4x256xf32>, i32 -> vector<4x256xf32>
    %c6_i32_53 = arith.constant 6 : i32
    %120 = vector.broadcast %c6_i32_53 : i32 to vector<4x256xi32>
    %121 = arith.cmpi sge, %2, %120 : vector<4x256xi32>
    %c3_i32 = arith.constant 3 : i32
    %122 = vector.broadcast %c3_i32 : i32 to vector<4x256xi32>
    %123 = arith.cmpi sge, %3, %122 : vector<4x256xi32>
    %124 = arith.andi %121, %123 : vector<4x256xi1>
    %cst_54 = arith.constant 0.000000e+00 : f32
    %125 = vector.broadcast %cst_54 : f32 to vector<4x256xf32>
    %126 = arith.select %124, %119, %125 : vector<4x256xi1>, vector<4x256xf32>
    %c1_55 = arith.constant 1 : index
    %c0_56 = arith.constant 0 : index
    %c0_57 = arith.constant 0 : index
    %127 = vector.load %arg6[%c1_55, %c0_56, %c0_57] : memref<25x4x1xf32, #tpu.memory_space<vmem>>, vector<1x4x1xf32>
    %128 = vector.shape_cast %127 : vector<1x4x1xf32> to vector<4x1xf32>
    %129 = vector.broadcast %128 : vector<4x1xf32> to vector<4x256xf32>
    %130 = arith.mulf %126, %129 : vector<4x256xf32>
    %131 = arith.addf %118, %130 : vector<4x256xf32>
    %c96_i32 = arith.constant 96 : i32
    %132 = tpu.dynamic_rotate %104 by %c96_i32 dim 1 : vector<4x256xf32>, i32 -> vector<4x256xf32>
    %c6_i32_58 = arith.constant 6 : i32
    %133 = vector.broadcast %c6_i32_58 : i32 to vector<4x256xi32>
    %134 = arith.cmpi sge, %2, %133 : vector<4x256xi32>
    %cst_59 = arith.constant 0.000000e+00 : f32
    %135 = vector.broadcast %cst_59 : f32 to vector<4x256xf32>
    %136 = arith.select %134, %132, %135 : vector<4x256xi1>, vector<4x256xf32>
    %c2_60 = arith.constant 2 : index
    %c0_61 = arith.constant 0 : index
    %c0_62 = arith.constant 0 : index
    %137 = vector.load %arg6[%c2_60, %c0_61, %c0_62] : memref<25x4x1xf32, #tpu.memory_space<vmem>>, vector<1x4x1xf32>
    %138 = vector.shape_cast %137 : vector<1x4x1xf32> to vector<4x1xf32>
    %139 = vector.broadcast %138 : vector<4x1xf32> to vector<4x256xf32>
    %140 = arith.mulf %136, %139 : vector<4x256xf32>
    %141 = arith.addf %131, %140 : vector<4x256xf32>
    %c93_i32 = arith.constant 93 : i32
    %142 = tpu.dynamic_rotate %104 by %c93_i32 dim 1 : vector<4x256xf32>, i32 -> vector<4x256xf32>
    %c6_i32_63 = arith.constant 6 : i32
    %143 = vector.broadcast %c6_i32_63 : i32 to vector<4x256xi32>
    %144 = arith.cmpi sge, %2, %143 : vector<4x256xi32>
    %c13_i32 = arith.constant 13 : i32
    %145 = vector.broadcast %c13_i32 : i32 to vector<4x256xi32>
    %146 = arith.cmpi slt, %3, %145 : vector<4x256xi32>
    %147 = arith.andi %144, %146 : vector<4x256xi1>
    %cst_64 = arith.constant 0.000000e+00 : f32
    %148 = vector.broadcast %cst_64 : f32 to vector<4x256xf32>
    %149 = arith.select %147, %142, %148 : vector<4x256xi1>, vector<4x256xf32>
    %c3_65 = arith.constant 3 : index
    %c0_66 = arith.constant 0 : index
    %c0_67 = arith.constant 0 : index
    %150 = vector.load %arg6[%c3_65, %c0_66, %c0_67] : memref<25x4x1xf32, #tpu.memory_space<vmem>>, vector<1x4x1xf32>
    %151 = vector.shape_cast %150 : vector<1x4x1xf32> to vector<4x1xf32>
    %152 = vector.broadcast %151 : vector<4x1xf32> to vector<4x256xf32>
    %153 = arith.mulf %149, %152 : vector<4x256xf32>
    %154 = arith.addf %141, %153 : vector<4x256xf32>
    %c90_i32 = arith.constant 90 : i32
    %155 = tpu.dynamic_rotate %104 by %c90_i32 dim 1 : vector<4x256xf32>, i32 -> vector<4x256xf32>
    %c6_i32_68 = arith.constant 6 : i32
    %156 = vector.broadcast %c6_i32_68 : i32 to vector<4x256xi32>
    %157 = arith.cmpi sge, %2, %156 : vector<4x256xi32>
    %c10_i32 = arith.constant 10 : i32
    %158 = vector.broadcast %c10_i32 : i32 to vector<4x256xi32>
    %159 = arith.cmpi slt, %3, %158 : vector<4x256xi32>
    %160 = arith.andi %157, %159 : vector<4x256xi1>
    %cst_69 = arith.constant 0.000000e+00 : f32
    %161 = vector.broadcast %cst_69 : f32 to vector<4x256xf32>
    %162 = arith.select %160, %155, %161 : vector<4x256xi1>, vector<4x256xf32>
    %c4_70 = arith.constant 4 : index
    %c0_71 = arith.constant 0 : index
    %c0_72 = arith.constant 0 : index
    %163 = vector.load %arg6[%c4_70, %c0_71, %c0_72] : memref<25x4x1xf32, #tpu.memory_space<vmem>>, vector<1x4x1xf32>
    %164 = vector.shape_cast %163 : vector<1x4x1xf32> to vector<4x1xf32>
    %165 = vector.broadcast %164 : vector<4x1xf32> to vector<4x256xf32>
    %166 = arith.mulf %162, %165 : vector<4x256xf32>
    %167 = arith.addf %154, %166 : vector<4x256xf32>
    %c54_i32 = arith.constant 54 : i32
    %168 = tpu.dynamic_rotate %104 by %c54_i32 dim 1 : vector<4x256xf32>, i32 -> vector<4x256xf32>
    %c3_i32_73 = arith.constant 3 : i32
    %169 = vector.broadcast %c3_i32_73 : i32 to vector<4x256xi32>
    %170 = arith.cmpi sge, %2, %169 : vector<4x256xi32>
    %c6_i32_74 = arith.constant 6 : i32
    %171 = vector.broadcast %c6_i32_74 : i32 to vector<4x256xi32>
    %172 = arith.cmpi sge, %3, %171 : vector<4x256xi32>
    %173 = arith.andi %170, %172 : vector<4x256xi1>
    %cst_75 = arith.constant 0.000000e+00 : f32
    %174 = vector.broadcast %cst_75 : f32 to vector<4x256xf32>
    %175 = arith.select %173, %168, %174 : vector<4x256xi1>, vector<4x256xf32>
    %c5_76 = arith.constant 5 : index
    %c0_77 = arith.constant 0 : index
    %c0_78 = arith.constant 0 : index
    %176 = vector.load %arg6[%c5_76, %c0_77, %c0_78] : memref<25x4x1xf32, #tpu.memory_space<vmem>>, vector<1x4x1xf32>
    %177 = vector.shape_cast %176 : vector<1x4x1xf32> to vector<4x1xf32>
    %178 = vector.broadcast %177 : vector<4x1xf32> to vector<4x256xf32>
    %179 = arith.mulf %175, %178 : vector<4x256xf32>
    %180 = arith.addf %167, %179 : vector<4x256xf32>
    %c51_i32 = arith.constant 51 : i32
    %181 = tpu.dynamic_rotate %104 by %c51_i32 dim 1 : vector<4x256xf32>, i32 -> vector<4x256xf32>
    %c3_i32_79 = arith.constant 3 : i32
    %182 = vector.broadcast %c3_i32_79 : i32 to vector<4x256xi32>
    %183 = arith.cmpi sge, %2, %182 : vector<4x256xi32>
    %c3_i32_80 = arith.constant 3 : i32
    %184 = vector.broadcast %c3_i32_80 : i32 to vector<4x256xi32>
    %185 = arith.cmpi sge, %3, %184 : vector<4x256xi32>
    %186 = arith.andi %183, %185 : vector<4x256xi1>
    %cst_81 = arith.constant 0.000000e+00 : f32
    %187 = vector.broadcast %cst_81 : f32 to vector<4x256xf32>
    %188 = arith.select %186, %181, %187 : vector<4x256xi1>, vector<4x256xf32>
    %c6_82 = arith.constant 6 : index
    %c0_83 = arith.constant 0 : index
    %c0_84 = arith.constant 0 : index
    %189 = vector.load %arg6[%c6_82, %c0_83, %c0_84] : memref<25x4x1xf32, #tpu.memory_space<vmem>>, vector<1x4x1xf32>
    %190 = vector.shape_cast %189 : vector<1x4x1xf32> to vector<4x1xf32>
    %191 = vector.broadcast %190 : vector<4x1xf32> to vector<4x256xf32>
    %192 = arith.mulf %188, %191 : vector<4x256xf32>
    %193 = arith.addf %180, %192 : vector<4x256xf32>
    %c48_i32 = arith.constant 48 : i32
    %194 = tpu.dynamic_rotate %104 by %c48_i32 dim 1 : vector<4x256xf32>, i32 -> vector<4x256xf32>
    %c3_i32_85 = arith.constant 3 : i32
    %195 = vector.broadcast %c3_i32_85 : i32 to vector<4x256xi32>
    %196 = arith.cmpi sge, %2, %195 : vector<4x256xi32>
    %cst_86 = arith.constant 0.000000e+00 : f32
    %197 = vector.broadcast %cst_86 : f32 to vector<4x256xf32>
    %198 = arith.select %196, %194, %197 : vector<4x256xi1>, vector<4x256xf32>
    %c7_87 = arith.constant 7 : index
    %c0_88 = arith.constant 0 : index
    %c0_89 = arith.constant 0 : index
    %199 = vector.load %arg6[%c7_87, %c0_88, %c0_89] : memref<25x4x1xf32, #tpu.memory_space<vmem>>, vector<1x4x1xf32>
    %200 = vector.shape_cast %199 : vector<1x4x1xf32> to vector<4x1xf32>
    %201 = vector.broadcast %200 : vector<4x1xf32> to vector<4x256xf32>
    %202 = arith.mulf %198, %201 : vector<4x256xf32>
    %203 = arith.addf %193, %202 : vector<4x256xf32>
    %c45_i32 = arith.constant 45 : i32
    %204 = tpu.dynamic_rotate %104 by %c45_i32 dim 1 : vector<4x256xf32>, i32 -> vector<4x256xf32>
    %c3_i32_90 = arith.constant 3 : i32
    %205 = vector.broadcast %c3_i32_90 : i32 to vector<4x256xi32>
    %206 = arith.cmpi sge, %2, %205 : vector<4x256xi32>
    %c13_i32_91 = arith.constant 13 : i32
    %207 = vector.broadcast %c13_i32_91 : i32 to vector<4x256xi32>
    %208 = arith.cmpi slt, %3, %207 : vector<4x256xi32>
    %209 = arith.andi %206, %208 : vector<4x256xi1>
    %cst_92 = arith.constant 0.000000e+00 : f32
    %210 = vector.broadcast %cst_92 : f32 to vector<4x256xf32>
    %211 = arith.select %209, %204, %210 : vector<4x256xi1>, vector<4x256xf32>
    %c8_93 = arith.constant 8 : index
    %c0_94 = arith.constant 0 : index
    %c0_95 = arith.constant 0 : index
    %212 = vector.load %arg6[%c8_93, %c0_94, %c0_95] : memref<25x4x1xf32, #tpu.memory_space<vmem>>, vector<1x4x1xf32>
    %213 = vector.shape_cast %212 : vector<1x4x1xf32> to vector<4x1xf32>
    %214 = vector.broadcast %213 : vector<4x1xf32> to vector<4x256xf32>
    %215 = arith.mulf %211, %214 : vector<4x256xf32>
    %216 = arith.addf %203, %215 : vector<4x256xf32>
    %c42_i32 = arith.constant 42 : i32
    %217 = tpu.dynamic_rotate %104 by %c42_i32 dim 1 : vector<4x256xf32>, i32 -> vector<4x256xf32>
    %c3_i32_96 = arith.constant 3 : i32
    %218 = vector.broadcast %c3_i32_96 : i32 to vector<4x256xi32>
    %219 = arith.cmpi sge, %2, %218 : vector<4x256xi32>
    %c10_i32_97 = arith.constant 10 : i32
    %220 = vector.broadcast %c10_i32_97 : i32 to vector<4x256xi32>
    %221 = arith.cmpi slt, %3, %220 : vector<4x256xi32>
    %222 = arith.andi %219, %221 : vector<4x256xi1>
    %cst_98 = arith.constant 0.000000e+00 : f32
    %223 = vector.broadcast %cst_98 : f32 to vector<4x256xf32>
    %224 = arith.select %222, %217, %223 : vector<4x256xi1>, vector<4x256xf32>
    %c9 = arith.constant 9 : index
    %c0_99 = arith.constant 0 : index
    %c0_100 = arith.constant 0 : index
    %225 = vector.load %arg6[%c9, %c0_99, %c0_100] : memref<25x4x1xf32, #tpu.memory_space<vmem>>, vector<1x4x1xf32>
    %226 = vector.shape_cast %225 : vector<1x4x1xf32> to vector<4x1xf32>
    %227 = vector.broadcast %226 : vector<4x1xf32> to vector<4x256xf32>
    %228 = arith.mulf %224, %227 : vector<4x256xf32>
    %229 = arith.addf %216, %228 : vector<4x256xf32>
    %c6_i32_101 = arith.constant 6 : i32
    %230 = tpu.dynamic_rotate %104 by %c6_i32_101 dim 1 : vector<4x256xf32>, i32 -> vector<4x256xf32>
    %c6_i32_102 = arith.constant 6 : i32
    %231 = vector.broadcast %c6_i32_102 : i32 to vector<4x256xi32>
    %232 = arith.cmpi sge, %3, %231 : vector<4x256xi32>
    %cst_103 = arith.constant 0.000000e+00 : f32
    %233 = vector.broadcast %cst_103 : f32 to vector<4x256xf32>
    %234 = arith.select %232, %230, %233 : vector<4x256xi1>, vector<4x256xf32>
    %c10 = arith.constant 10 : index
    %c0_104 = arith.constant 0 : index
    %c0_105 = arith.constant 0 : index
    %235 = vector.load %arg6[%c10, %c0_104, %c0_105] : memref<25x4x1xf32, #tpu.memory_space<vmem>>, vector<1x4x1xf32>
    %236 = vector.shape_cast %235 : vector<1x4x1xf32> to vector<4x1xf32>
    %237 = vector.broadcast %236 : vector<4x1xf32> to vector<4x256xf32>
    %238 = arith.mulf %234, %237 : vector<4x256xf32>
    %239 = arith.addf %229, %238 : vector<4x256xf32>
    %c3_i32_106 = arith.constant 3 : i32
    %240 = tpu.dynamic_rotate %104 by %c3_i32_106 dim 1 : vector<4x256xf32>, i32 -> vector<4x256xf32>
    %c3_i32_107 = arith.constant 3 : i32
    %241 = vector.broadcast %c3_i32_107 : i32 to vector<4x256xi32>
    %242 = arith.cmpi sge, %3, %241 : vector<4x256xi32>
    %cst_108 = arith.constant 0.000000e+00 : f32
    %243 = vector.broadcast %cst_108 : f32 to vector<4x256xf32>
    %244 = arith.select %242, %240, %243 : vector<4x256xi1>, vector<4x256xf32>
    %c11 = arith.constant 11 : index
    %c0_109 = arith.constant 0 : index
    %c0_110 = arith.constant 0 : index
    %245 = vector.load %arg6[%c11, %c0_109, %c0_110] : memref<25x4x1xf32, #tpu.memory_space<vmem>>, vector<1x4x1xf32>
    %246 = vector.shape_cast %245 : vector<1x4x1xf32> to vector<4x1xf32>
    %247 = vector.broadcast %246 : vector<4x1xf32> to vector<4x256xf32>
    %248 = arith.mulf %244, %247 : vector<4x256xf32>
    %249 = arith.addf %239, %248 : vector<4x256xf32>
    %c12 = arith.constant 12 : index
    %c0_111 = arith.constant 0 : index
    %c0_112 = arith.constant 0 : index
    %250 = vector.load %arg6[%c12, %c0_111, %c0_112] : memref<25x4x1xf32, #tpu.memory_space<vmem>>, vector<1x4x1xf32>
    %251 = vector.shape_cast %250 : vector<1x4x1xf32> to vector<4x1xf32>
    %252 = vector.broadcast %251 : vector<4x1xf32> to vector<4x256xf32>
    %253 = arith.mulf %104, %252 : vector<4x256xf32>
    %254 = arith.addf %249, %253 : vector<4x256xf32>
    %c253_i32 = arith.constant 253 : i32
    %255 = tpu.dynamic_rotate %104 by %c253_i32 dim 1 : vector<4x256xf32>, i32 -> vector<4x256xf32>
    %c13_i32_113 = arith.constant 13 : i32
    %256 = vector.broadcast %c13_i32_113 : i32 to vector<4x256xi32>
    %257 = arith.cmpi slt, %3, %256 : vector<4x256xi32>
    %cst_114 = arith.constant 0.000000e+00 : f32
    %258 = vector.broadcast %cst_114 : f32 to vector<4x256xf32>
    %259 = arith.select %257, %255, %258 : vector<4x256xi1>, vector<4x256xf32>
    %c13 = arith.constant 13 : index
    %c0_115 = arith.constant 0 : index
    %c0_116 = arith.constant 0 : index
    %260 = vector.load %arg6[%c13, %c0_115, %c0_116] : memref<25x4x1xf32, #tpu.memory_space<vmem>>, vector<1x4x1xf32>
    %261 = vector.shape_cast %260 : vector<1x4x1xf32> to vector<4x1xf32>
    %262 = vector.broadcast %261 : vector<4x1xf32> to vector<4x256xf32>
    %263 = arith.mulf %259, %262 : vector<4x256xf32>
    %264 = arith.addf %254, %263 : vector<4x256xf32>
    %c250_i32 = arith.constant 250 : i32
    %265 = tpu.dynamic_rotate %104 by %c250_i32 dim 1 : vector<4x256xf32>, i32 -> vector<4x256xf32>
    %c10_i32_117 = arith.constant 10 : i32
    %266 = vector.broadcast %c10_i32_117 : i32 to vector<4x256xi32>
    %267 = arith.cmpi slt, %3, %266 : vector<4x256xi32>
    %cst_118 = arith.constant 0.000000e+00 : f32
    %268 = vector.broadcast %cst_118 : f32 to vector<4x256xf32>
    %269 = arith.select %267, %265, %268 : vector<4x256xi1>, vector<4x256xf32>
    %c14 = arith.constant 14 : index
    %c0_119 = arith.constant 0 : index
    %c0_120 = arith.constant 0 : index
    %270 = vector.load %arg6[%c14, %c0_119, %c0_120] : memref<25x4x1xf32, #tpu.memory_space<vmem>>, vector<1x4x1xf32>
    %271 = vector.shape_cast %270 : vector<1x4x1xf32> to vector<4x1xf32>
    %272 = vector.broadcast %271 : vector<4x1xf32> to vector<4x256xf32>
    %273 = arith.mulf %269, %272 : vector<4x256xf32>
    %274 = arith.addf %264, %273 : vector<4x256xf32>
    %c214_i32 = arith.constant 214 : i32
    %275 = tpu.dynamic_rotate %104 by %c214_i32 dim 1 : vector<4x256xf32>, i32 -> vector<4x256xf32>
    %c13_i32_121 = arith.constant 13 : i32
    %276 = vector.broadcast %c13_i32_121 : i32 to vector<4x256xi32>
    %277 = arith.cmpi slt, %2, %276 : vector<4x256xi32>
    %c6_i32_122 = arith.constant 6 : i32
    %278 = vector.broadcast %c6_i32_122 : i32 to vector<4x256xi32>
    %279 = arith.cmpi sge, %3, %278 : vector<4x256xi32>
    %280 = arith.andi %277, %279 : vector<4x256xi1>
    %cst_123 = arith.constant 0.000000e+00 : f32
    %281 = vector.broadcast %cst_123 : f32 to vector<4x256xf32>
    %282 = arith.select %280, %275, %281 : vector<4x256xi1>, vector<4x256xf32>
    %c15 = arith.constant 15 : index
    %c0_124 = arith.constant 0 : index
    %c0_125 = arith.constant 0 : index
    %283 = vector.load %arg6[%c15, %c0_124, %c0_125] : memref<25x4x1xf32, #tpu.memory_space<vmem>>, vector<1x4x1xf32>
    %284 = vector.shape_cast %283 : vector<1x4x1xf32> to vector<4x1xf32>
    %285 = vector.broadcast %284 : vector<4x1xf32> to vector<4x256xf32>
    %286 = arith.mulf %282, %285 : vector<4x256xf32>
    %287 = arith.addf %274, %286 : vector<4x256xf32>
    %c211_i32 = arith.constant 211 : i32
    %288 = tpu.dynamic_rotate %104 by %c211_i32 dim 1 : vector<4x256xf32>, i32 -> vector<4x256xf32>
    %c13_i32_126 = arith.constant 13 : i32
    %289 = vector.broadcast %c13_i32_126 : i32 to vector<4x256xi32>
    %290 = arith.cmpi slt, %2, %289 : vector<4x256xi32>
    %c3_i32_127 = arith.constant 3 : i32
    %291 = vector.broadcast %c3_i32_127 : i32 to vector<4x256xi32>
    %292 = arith.cmpi sge, %3, %291 : vector<4x256xi32>
    %293 = arith.andi %290, %292 : vector<4x256xi1>
    %cst_128 = arith.constant 0.000000e+00 : f32
    %294 = vector.broadcast %cst_128 : f32 to vector<4x256xf32>
    %295 = arith.select %293, %288, %294 : vector<4x256xi1>, vector<4x256xf32>
    %c16 = arith.constant 16 : index
    %c0_129 = arith.constant 0 : index
    %c0_130 = arith.constant 0 : index
    %296 = vector.load %arg6[%c16, %c0_129, %c0_130] : memref<25x4x1xf32, #tpu.memory_space<vmem>>, vector<1x4x1xf32>
    %297 = vector.shape_cast %296 : vector<1x4x1xf32> to vector<4x1xf32>
    %298 = vector.broadcast %297 : vector<4x1xf32> to vector<4x256xf32>
    %299 = arith.mulf %295, %298 : vector<4x256xf32>
    %300 = arith.addf %287, %299 : vector<4x256xf32>
    %c208_i32 = arith.constant 208 : i32
    %301 = tpu.dynamic_rotate %104 by %c208_i32 dim 1 : vector<4x256xf32>, i32 -> vector<4x256xf32>
    %c13_i32_131 = arith.constant 13 : i32
    %302 = vector.broadcast %c13_i32_131 : i32 to vector<4x256xi32>
    %303 = arith.cmpi slt, %2, %302 : vector<4x256xi32>
    %cst_132 = arith.constant 0.000000e+00 : f32
    %304 = vector.broadcast %cst_132 : f32 to vector<4x256xf32>
    %305 = arith.select %303, %301, %304 : vector<4x256xi1>, vector<4x256xf32>
    %c17 = arith.constant 17 : index
    %c0_133 = arith.constant 0 : index
    %c0_134 = arith.constant 0 : index
    %306 = vector.load %arg6[%c17, %c0_133, %c0_134] : memref<25x4x1xf32, #tpu.memory_space<vmem>>, vector<1x4x1xf32>
    %307 = vector.shape_cast %306 : vector<1x4x1xf32> to vector<4x1xf32>
    %308 = vector.broadcast %307 : vector<4x1xf32> to vector<4x256xf32>
    %309 = arith.mulf %305, %308 : vector<4x256xf32>
    %310 = arith.addf %300, %309 : vector<4x256xf32>
    %c205_i32 = arith.constant 205 : i32
    %311 = tpu.dynamic_rotate %104 by %c205_i32 dim 1 : vector<4x256xf32>, i32 -> vector<4x256xf32>
    %c13_i32_135 = arith.constant 13 : i32
    %312 = vector.broadcast %c13_i32_135 : i32 to vector<4x256xi32>
    %313 = arith.cmpi slt, %2, %312 : vector<4x256xi32>
    %c13_i32_136 = arith.constant 13 : i32
    %314 = vector.broadcast %c13_i32_136 : i32 to vector<4x256xi32>
    %315 = arith.cmpi slt, %3, %314 : vector<4x256xi32>
    %316 = arith.andi %313, %315 : vector<4x256xi1>
    %cst_137 = arith.constant 0.000000e+00 : f32
    %317 = vector.broadcast %cst_137 : f32 to vector<4x256xf32>
    %318 = arith.select %316, %311, %317 : vector<4x256xi1>, vector<4x256xf32>
    %c18 = arith.constant 18 : index
    %c0_138 = arith.constant 0 : index
    %c0_139 = arith.constant 0 : index
    %319 = vector.load %arg6[%c18, %c0_138, %c0_139] : memref<25x4x1xf32, #tpu.memory_space<vmem>>, vector<1x4x1xf32>
    %320 = vector.shape_cast %319 : vector<1x4x1xf32> to vector<4x1xf32>
    %321 = vector.broadcast %320 : vector<4x1xf32> to vector<4x256xf32>
    %322 = arith.mulf %318, %321 : vector<4x256xf32>
    %323 = arith.addf %310, %322 : vector<4x256xf32>
    %c202_i32 = arith.constant 202 : i32
    %324 = tpu.dynamic_rotate %104 by %c202_i32 dim 1 : vector<4x256xf32>, i32 -> vector<4x256xf32>
    %c13_i32_140 = arith.constant 13 : i32
    %325 = vector.broadcast %c13_i32_140 : i32 to vector<4x256xi32>
    %326 = arith.cmpi slt, %2, %325 : vector<4x256xi32>
    %c10_i32_141 = arith.constant 10 : i32
    %327 = vector.broadcast %c10_i32_141 : i32 to vector<4x256xi32>
    %328 = arith.cmpi slt, %3, %327 : vector<4x256xi32>
    %329 = arith.andi %326, %328 : vector<4x256xi1>
    %cst_142 = arith.constant 0.000000e+00 : f32
    %330 = vector.broadcast %cst_142 : f32 to vector<4x256xf32>
    %331 = arith.select %329, %324, %330 : vector<4x256xi1>, vector<4x256xf32>
    %c19 = arith.constant 19 : index
    %c0_143 = arith.constant 0 : index
    %c0_144 = arith.constant 0 : index
    %332 = vector.load %arg6[%c19, %c0_143, %c0_144] : memref<25x4x1xf32, #tpu.memory_space<vmem>>, vector<1x4x1xf32>
    %333 = vector.shape_cast %332 : vector<1x4x1xf32> to vector<4x1xf32>
    %334 = vector.broadcast %333 : vector<4x1xf32> to vector<4x256xf32>
    %335 = arith.mulf %331, %334 : vector<4x256xf32>
    %336 = arith.addf %323, %335 : vector<4x256xf32>
    %c166_i32 = arith.constant 166 : i32
    %337 = tpu.dynamic_rotate %104 by %c166_i32 dim 1 : vector<4x256xf32>, i32 -> vector<4x256xf32>
    %c10_i32_145 = arith.constant 10 : i32
    %338 = vector.broadcast %c10_i32_145 : i32 to vector<4x256xi32>
    %339 = arith.cmpi slt, %2, %338 : vector<4x256xi32>
    %c6_i32_146 = arith.constant 6 : i32
    %340 = vector.broadcast %c6_i32_146 : i32 to vector<4x256xi32>
    %341 = arith.cmpi sge, %3, %340 : vector<4x256xi32>
    %342 = arith.andi %339, %341 : vector<4x256xi1>
    %cst_147 = arith.constant 0.000000e+00 : f32
    %343 = vector.broadcast %cst_147 : f32 to vector<4x256xf32>
    %344 = arith.select %342, %337, %343 : vector<4x256xi1>, vector<4x256xf32>
    %c20 = arith.constant 20 : index
    %c0_148 = arith.constant 0 : index
    %c0_149 = arith.constant 0 : index
    %345 = vector.load %arg6[%c20, %c0_148, %c0_149] : memref<25x4x1xf32, #tpu.memory_space<vmem>>, vector<1x4x1xf32>
    %346 = vector.shape_cast %345 : vector<1x4x1xf32> to vector<4x1xf32>
    %347 = vector.broadcast %346 : vector<4x1xf32> to vector<4x256xf32>
    %348 = arith.mulf %344, %347 : vector<4x256xf32>
    %349 = arith.addf %336, %348 : vector<4x256xf32>
    %c163_i32 = arith.constant 163 : i32
    %350 = tpu.dynamic_rotate %104 by %c163_i32 dim 1 : vector<4x256xf32>, i32 -> vector<4x256xf32>
    %c10_i32_150 = arith.constant 10 : i32
    %351 = vector.broadcast %c10_i32_150 : i32 to vector<4x256xi32>
    %352 = arith.cmpi slt, %2, %351 : vector<4x256xi32>
    %c3_i32_151 = arith.constant 3 : i32
    %353 = vector.broadcast %c3_i32_151 : i32 to vector<4x256xi32>
    %354 = arith.cmpi sge, %3, %353 : vector<4x256xi32>
    %355 = arith.andi %352, %354 : vector<4x256xi1>
    %cst_152 = arith.constant 0.000000e+00 : f32
    %356 = vector.broadcast %cst_152 : f32 to vector<4x256xf32>
    %357 = arith.select %355, %350, %356 : vector<4x256xi1>, vector<4x256xf32>
    %c21 = arith.constant 21 : index
    %c0_153 = arith.constant 0 : index
    %c0_154 = arith.constant 0 : index
    %358 = vector.load %arg6[%c21, %c0_153, %c0_154] : memref<25x4x1xf32, #tpu.memory_space<vmem>>, vector<1x4x1xf32>
    %359 = vector.shape_cast %358 : vector<1x4x1xf32> to vector<4x1xf32>
    %360 = vector.broadcast %359 : vector<4x1xf32> to vector<4x256xf32>
    %361 = arith.mulf %357, %360 : vector<4x256xf32>
    %362 = arith.addf %349, %361 : vector<4x256xf32>
    %c160_i32 = arith.constant 160 : i32
    %363 = tpu.dynamic_rotate %104 by %c160_i32 dim 1 : vector<4x256xf32>, i32 -> vector<4x256xf32>
    %c10_i32_155 = arith.constant 10 : i32
    %364 = vector.broadcast %c10_i32_155 : i32 to vector<4x256xi32>
    %365 = arith.cmpi slt, %2, %364 : vector<4x256xi32>
    %cst_156 = arith.constant 0.000000e+00 : f32
    %366 = vector.broadcast %cst_156 : f32 to vector<4x256xf32>
    %367 = arith.select %365, %363, %366 : vector<4x256xi1>, vector<4x256xf32>
    %c22 = arith.constant 22 : index
    %c0_157 = arith.constant 0 : index
    %c0_158 = arith.constant 0 : index
    %368 = vector.load %arg6[%c22, %c0_157, %c0_158] : memref<25x4x1xf32, #tpu.memory_space<vmem>>, vector<1x4x1xf32>
    %369 = vector.shape_cast %368 : vector<1x4x1xf32> to vector<4x1xf32>
    %370 = vector.broadcast %369 : vector<4x1xf32> to vector<4x256xf32>
    %371 = arith.mulf %367, %370 : vector<4x256xf32>
    %372 = arith.addf %362, %371 : vector<4x256xf32>
    %c157_i32 = arith.constant 157 : i32
    %373 = tpu.dynamic_rotate %104 by %c157_i32 dim 1 : vector<4x256xf32>, i32 -> vector<4x256xf32>
    %c10_i32_159 = arith.constant 10 : i32
    %374 = vector.broadcast %c10_i32_159 : i32 to vector<4x256xi32>
    %375 = arith.cmpi slt, %2, %374 : vector<4x256xi32>
    %c13_i32_160 = arith.constant 13 : i32
    %376 = vector.broadcast %c13_i32_160 : i32 to vector<4x256xi32>
    %377 = arith.cmpi slt, %3, %376 : vector<4x256xi32>
    %378 = arith.andi %375, %377 : vector<4x256xi1>
    %cst_161 = arith.constant 0.000000e+00 : f32
    %379 = vector.broadcast %cst_161 : f32 to vector<4x256xf32>
    %380 = arith.select %378, %373, %379 : vector<4x256xi1>, vector<4x256xf32>
    %c23 = arith.constant 23 : index
    %c0_162 = arith.constant 0 : index
    %c0_163 = arith.constant 0 : index
    %381 = vector.load %arg6[%c23, %c0_162, %c0_163] : memref<25x4x1xf32, #tpu.memory_space<vmem>>, vector<1x4x1xf32>
    %382 = vector.shape_cast %381 : vector<1x4x1xf32> to vector<4x1xf32>
    %383 = vector.broadcast %382 : vector<4x1xf32> to vector<4x256xf32>
    %384 = arith.mulf %380, %383 : vector<4x256xf32>
    %385 = arith.addf %372, %384 : vector<4x256xf32>
    %c154_i32 = arith.constant 154 : i32
    %386 = tpu.dynamic_rotate %104 by %c154_i32 dim 1 : vector<4x256xf32>, i32 -> vector<4x256xf32>
    %c10_i32_164 = arith.constant 10 : i32
    %387 = vector.broadcast %c10_i32_164 : i32 to vector<4x256xi32>
    %388 = arith.cmpi slt, %2, %387 : vector<4x256xi32>
    %c10_i32_165 = arith.constant 10 : i32
    %389 = vector.broadcast %c10_i32_165 : i32 to vector<4x256xi32>
    %390 = arith.cmpi slt, %3, %389 : vector<4x256xi32>
    %391 = arith.andi %388, %390 : vector<4x256xi1>
    %cst_166 = arith.constant 0.000000e+00 : f32
    %392 = vector.broadcast %cst_166 : f32 to vector<4x256xf32>
    %393 = arith.select %391, %386, %392 : vector<4x256xi1>, vector<4x256xf32>
    %c24 = arith.constant 24 : index
    %c0_167 = arith.constant 0 : index
    %c0_168 = arith.constant 0 : index
    %394 = vector.load %arg6[%c24, %c0_167, %c0_168] : memref<25x4x1xf32, #tpu.memory_space<vmem>>, vector<1x4x1xf32>
    %395 = vector.shape_cast %394 : vector<1x4x1xf32> to vector<4x1xf32>
    %396 = vector.broadcast %395 : vector<4x1xf32> to vector<4x256xf32>
    %397 = arith.mulf %393, %396 : vector<4x256xf32>
    %398 = arith.addf %385, %397 : vector<4x256xf32>
    %c0_169 = arith.constant 0 : index
    %c0_170 = arith.constant 0 : index
    %399 = vector.load %arg7[%c0_169, %c0_170] : memref<4x1xf32, #tpu.memory_space<vmem>>, vector<4x1xf32>
    %400 = vector.broadcast %399 : vector<4x1xf32> to vector<4x256xf32>
    %401 = arith.addf %398, %400 : vector<4x256xf32>
    %cst_171 = arith.constant 0.000000e+00 : f32
    %402 = vector.broadcast %cst_171 : f32 to vector<4x256xf32>
    %c0_172 = arith.constant 0 : index
    %c0_173 = arith.constant 0 : index
    %c0_174 = arith.constant 0 : index
    %403 = vector.load %arg8[%c0_172, %c0_173, %c0_174] : memref<4x4x1xf32, #tpu.memory_space<vmem>>, vector<1x4x1xf32>
    %404 = vector.shape_cast %403 : vector<1x4x1xf32> to vector<4x1xf32>
    %405 = vector.extract_strided_slice %401 {offsets = [0, 0], sizes = [1, 256], strides = [1, 1]} : vector<4x256xf32> to vector<1x256xf32>
    %406 = vector.broadcast %404 : vector<4x1xf32> to vector<4x256xf32>
    %407 = vector.broadcast %405 : vector<1x256xf32> to vector<4x256xf32>
    %408 = arith.mulf %406, %407 : vector<4x256xf32>
    %409 = arith.addf %402, %408 : vector<4x256xf32>
    %c1_175 = arith.constant 1 : index
    %c0_176 = arith.constant 0 : index
    %c0_177 = arith.constant 0 : index
    %410 = vector.load %arg8[%c1_175, %c0_176, %c0_177] : memref<4x4x1xf32, #tpu.memory_space<vmem>>, vector<1x4x1xf32>
    %411 = vector.shape_cast %410 : vector<1x4x1xf32> to vector<4x1xf32>
    %412 = vector.extract_strided_slice %401 {offsets = [1, 0], sizes = [1, 256], strides = [1, 1]} : vector<4x256xf32> to vector<1x256xf32>
    %413 = vector.broadcast %411 : vector<4x1xf32> to vector<4x256xf32>
    %414 = vector.broadcast %412 : vector<1x256xf32> to vector<4x256xf32>
    %415 = arith.mulf %413, %414 : vector<4x256xf32>
    %416 = arith.addf %409, %415 : vector<4x256xf32>
    %c2_178 = arith.constant 2 : index
    %c0_179 = arith.constant 0 : index
    %c0_180 = arith.constant 0 : index
    %417 = vector.load %arg8[%c2_178, %c0_179, %c0_180] : memref<4x4x1xf32, #tpu.memory_space<vmem>>, vector<1x4x1xf32>
    %418 = vector.shape_cast %417 : vector<1x4x1xf32> to vector<4x1xf32>
    %419 = vector.extract_strided_slice %401 {offsets = [2, 0], sizes = [1, 256], strides = [1, 1]} : vector<4x256xf32> to vector<1x256xf32>
    %420 = vector.broadcast %418 : vector<4x1xf32> to vector<4x256xf32>
    %421 = vector.broadcast %419 : vector<1x256xf32> to vector<4x256xf32>
    %422 = arith.mulf %420, %421 : vector<4x256xf32>
    %423 = arith.addf %416, %422 : vector<4x256xf32>
    %c3_181 = arith.constant 3 : index
    %c0_182 = arith.constant 0 : index
    %c0_183 = arith.constant 0 : index
    %424 = vector.load %arg8[%c3_181, %c0_182, %c0_183] : memref<4x4x1xf32, #tpu.memory_space<vmem>>, vector<1x4x1xf32>
    %425 = vector.shape_cast %424 : vector<1x4x1xf32> to vector<4x1xf32>
    %426 = vector.extract_strided_slice %401 {offsets = [3, 0], sizes = [1, 256], strides = [1, 1]} : vector<4x256xf32> to vector<1x256xf32>
    %427 = vector.broadcast %425 : vector<4x1xf32> to vector<4x256xf32>
    %428 = vector.broadcast %426 : vector<1x256xf32> to vector<4x256xf32>
    %429 = arith.mulf %427, %428 : vector<4x256xf32>
    %430 = arith.addf %423, %429 : vector<4x256xf32>
    %c0_184 = arith.constant 0 : index
    %c0_185 = arith.constant 0 : index
    %431 = vector.load %arg9[%c0_184, %c0_185] : memref<4x1xf32, #tpu.memory_space<vmem>>, vector<4x1xf32>
    %432 = vector.broadcast %431 : vector<4x1xf32> to vector<4x256xf32>
    %433 = arith.addf %430, %432 : vector<4x256xf32>
    %434 = arith.mulf %1, %433 : vector<4x256xf32>
    %c0_186 = arith.constant 0 : index
    %c0_187 = arith.constant 0 : index
    %c0_188 = arith.constant 0 : index
    %435 = vector.load %arg10[%c0_186, %c0_187, %c0_188] : memref<1x4x256xf32, #tpu.memory_space<vmem>>, vector<1x4x256xf32>
    %436 = vector.shape_cast %435 : vector<1x4x256xf32> to vector<4x256xf32>
    %437 = vector.shape_cast %434 : vector<4x256xf32> to vector<1x4x256xf32>
    tpu.vector_store %arg10[%c0_186, %c0_187, %c0_188], %437 {strides = array<i32>} : memref<1x4x256xf32, #tpu.memory_space<vmem>>, vector<1x4x256xf32>,
    return
  }
  func.func @transform_0(%arg0: i32) -> (i32, i32, i32) {
    %c0_i32 = arith.constant 0 : i32
    %c0_i32_0 = arith.constant 0 : i32
    %c0_i32_1 = arith.constant 0 : i32
    return %arg0, %c0_i32, %c0_i32_0 : i32, i32, i32
  }
  func.func @transform_1(%arg0: i32) -> (i32, i32) {
    %c0_i32 = arith.constant 0 : i32
    %c0_i32_0 = arith.constant 0 : i32
    %c0_i32_1 = arith.constant 0 : i32
    return %c0_i32, %c0_i32_0 : i32, i32
  }
  func.func @transform_2(%arg0: i32) -> (i32, i32) {
    %c0_i32 = arith.constant 0 : i32
    %c0_i32_0 = arith.constant 0 : i32
    %c0_i32_1 = arith.constant 0 : i32
    return %c0_i32, %c0_i32_0 : i32, i32
  }
  func.func @transform_3(%arg0: i32) -> (i32, i32, i32) {
    %c0_i32 = arith.constant 0 : i32
    %c0_i32_0 = arith.constant 0 : i32
    %c0_i32_1 = arith.constant 0 : i32
    %c0_i32_2 = arith.constant 0 : i32
    return %c0_i32, %c0_i32_0, %c0_i32_1 : i32, i32, i32
  }
  func.func @transform_4(%arg0: i32) -> (i32, i32) {
    %c0_i32 = arith.constant 0 : i32
    %c0_i32_0 = arith.constant 0 : i32
    %c0_i32_1 = arith.constant 0 : i32
    return %c0_i32, %c0_i32_0 : i32, i32
  }
  func.func @transform_5(%arg0: i32) -> (i32, i32, i32) {
    %c0_i32 = arith.constant 0 : i32
    %c0_i32_0 = arith.constant 0 : i32
    %c0_i32_1 = arith.constant 0 : i32
    %c0_i32_2 = arith.constant 0 : i32
    return %c0_i32, %c0_i32_0, %c0_i32_1 : i32, i32, i32
  }
  func.func @transform_6(%arg0: i32) -> (i32, i32) {
    %c0_i32 = arith.constant 0 : i32
    %c0_i32_0 = arith.constant 0 : i32
    %c0_i32_1 = arith.constant 0 : i32
    return %c0_i32, %c0_i32_0 : i32, i32
  }
  func.func @transform_7(%arg0: i32) -> (i32, i32, i32) {
    %c0_i32 = arith.constant 0 : i32
    %c0_i32_0 = arith.constant 0 : i32
    %c0_i32_1 = arith.constant 0 : i32
    %c0_i32_2 = arith.constant 0 : i32
    return %c0_i32, %c0_i32_0, %c0_i32_1 : i32, i32, i32
  }
  func.func @transform_8(%arg0: i32) -> (i32, i32) {
    %c0_i32 = arith.constant 0 : i32
    %c0_i32_0 = arith.constant 0 : i32
    %c0_i32_1 = arith.constant 0 : i32
    return %c0_i32, %c0_i32_0 : i32, i32
  }
  func.func @transform_9(%arg0: i32) -> (i32, i32, i32) {
    %c0_i32 = arith.constant 0 : i32
    %c0_i32_0 = arith.constant 0 : i32
    %c0_i32_1 = arith.constant 0 : i32
    return %arg0, %c0_i32, %c0_i32_0 : i32, i32, i32
  }
}

</mosaic_0001>

<bundles_post_ra>
// kernel: tpu_custom_call.1
= control target key start
LH: loop header
LB: loop body
LE: loop exit
PB: predicated region body
PF: predicated region fallthrough
CT: control target
= control target key end

     0   :  { %14 = vsyncpa [#allocation3], 0  ;;  %s2483_s0 = inlined_call_operand.vmem [shape: f32[2,4,256], index: 0, kind: input, shape index: {}]   ;;  %s2484_s1 = inlined_call_operand.vmem [shape: s32[4,256], index: 1, kind: input, shape index: {}]   ;;  %s2485_s2 = inlined_call_operand.vmem [shape: s32[4,256], index: 2, kind: input, shape index: {}]   ;;  %s2486_s3 = inlined_call_operand.vmem [shape: f32[9,4,1], index: 3, kind: input, shape index: {}]   ;;  %s2487_s4 = inlined_call_operand.vmem [shape: f32[4,1], index: 4, kind: input, shape index: {}]   ;;  %s2488_s5 = inlined_call_operand.vmem [shape: f32[25,4,1], index: 5, kind: input, shape index: {}]   ;;  %s2489_s6 = inlined_call_operand.vmem [shape: f32[4,1], index: 6, kind: input, shape index: {}]   ;;  %s2490_s7 = inlined_call_operand.vmem [shape: f32[4,4,1], index: 7, kind: input, shape index: {}]   ;;  %s2491_s8 = inlined_call_operand.vmem [shape: f32[4,1], index: 8, kind: input, shape index: {}]   ;;  %s2492_s9 = inlined_call_operand.hbm [shape: f32[2,4,256], index: 9, kind: output, shape index: {}]  }
   0x1   :  { %16 = vsyncpa [#allocation3 + $0x1], 0  ;;  %s1842_s30 = smov 0   ;;  %s1844_s10 = smov 0  }
   0x2   :  { %s1846_s11 = smov 0   ;;  %s1848_s12 = smov 0  }
   0x3 LB: > { %s1863_s13 = sadd.s32 4294967295, %s1756_s12   ;;  %s1568_s14 = sadd.s32 4294967294, %s1756_s12   ;;  %s1756_s12 = sphi %s1848_s12, %s2506_s12   ;;  %s1752_s11 = sphi %s1846_s11, %s2505_s11   ;;  %s1748_s10 = sphi %s1844_s10, %s2504_s10   ;;  %s1744_s30 = sphi %s1842_s30, %s2503_s30  }
   0x4   : > { %s1867_s15 = sadd.s32 1, %s1756_s12   ;;  %s223_s16 = sadd.s32 1, %s1752_s11 }
   0x5   : > { %s220_s17 = ssub.s32 %s1756_s12, %s1867_s15  ;;  %p233_p0 = scmp.ne.s32.totalorder %s1752_s11, %s1748_s10 }
   0x6   : > { %p221_p1 = scmp.eq.s32.totalorder %s220_s17, 0  ;;  %p234_p2 = scmp.eq.s32.totalorder %s1863_s13, 1 }
   0x7   : > { %p239_p3 = scmp.ne.s32.totalorder %s1748_s10, %s1744_s30  ;;  %p240_p4 = scmp.eq.s32.totalorder %s1568_s14, 1 }
   0x8   : > { %s1878_s18 = scalar_select %p221_p1, %s1752_s11, %s223_s16  }
   0x9   : > { %p1880_p5 = por %p234_p2, %p233_p0  ;;  %p1884_p6 = por %p240_p4, %p239_p3 }
   0xa   : > { %p1571_p7 = scmp.ge.s32.totalorder %s1756_s12, 1  ;;  %p290_p8 = scmp.lt.s32.totalorder %s1756_s12, 3 }
   0xc   : > { %p291_p9 = pnand %p1571_p7, %p290_p8 }
   0xd   : > { %p326_p10 = scmp.lt.s32.totalorder (!%p291_p9), %s1863_s13, 1  ;;  %s1759_s17 = smov (!%p291_p9), 17  }
   0xe   : > { %294 = sbr.rel (%p291_p9) target bundleno = 567 (0x237), region = 56  ;;  %s1760_s21 = smov (!%p291_p9), 16  }
   0xf   : > { %s1761_s24 = smov (!%p291_p9), 15   ;;  %s1762_s27 = smov (!%p291_p9), 1  }
  0x10   : > { %s1763_s14 = smov (!%p291_p9), 127   ;;  %s1764_s16 = smov (!%p291_p9), 113  }
  0x11   : > { %s1765_s22 = smov (!%p291_p9), 112   ;;  %s1773_s23 = smov (!%p291_p9), 54  }
  0x12   : > { %s1778_s28 = smov (!%p291_p9), 6  }
  0x13   : > { %v1575_v0 = vld [vmem:[%s2486_s3 + $0x4] sm:$0xf]  ;;  %v359_v1 = vld [vmem:[%s2486_s3] sm:$0xf]  ;;  %v1758_v2 = vmov 0   ;;  %s327_s25 = scalar_select %p326_p10, %s1863_s13, 1  ;;  %v344_v58 = vlaneseq }
  0x14   : > { %1691 = vset.pattern.permute.xlu2 %v1758_v2  ;;  %1690 = vset.pattern.permute.xlu1 %v1758_v2  ;;  %v1576_v4 = vld [vmem:[%s2486_s3 + $0x8] sm:$0xf]  ;;  %v1577_v9 = vld [vmem:[%s2486_s3 + $0xc] sm:$0xf]  ;;  %v1579_v12 = vld [vmem:[%s2486_s3 + $0x14] sm:$0xf] }
  0x15   : > { %393 = vperm.xlu2 %1691, %v1575_v0   ;;  %362 = vperm.xlu1 %1690, %v359_v1   ;;  %s1615_s26 = sshll.u32 %s327_s25, 3  ;;  %v1578_v15 = vld [vmem:[%s2486_s3 + $0x10] sm:$0xf]  ;;  %v1580_v20 = vld [vmem:[%s2486_s3 + $0x18] sm:$0xf]  ;;  %s1766_s25 = smov 111  }
  0x16   : > { %1692 = vset.pattern.permute.xlu0 %v1758_v2  ;;  %s330_s29 = scalar_lea.vmem %s2483_s0, %s1615_s26  ;;  %v1581_v23 = vld [vmem:[%s2486_s3 + $0x1c] sm:$0xf]  ;;  %v1582_v26 = vld [vmem:[%s2486_s3 + $0x20] sm:$0xf]  ;;  %v1594_v27 = vld [vmem:[%s2488_s5 + $0x30] sm:$0xf] }
  0x17   : > { %v1901_v3 = vld [vmem:[%s330_s29] sm:$0xff]  ;;  %v1595_v29 = vld [vmem:[%s2488_s5 + $0x34] sm:$0xf]  ;;  %v1596_v31 = vld [vmem:[%s2488_s5 + $0x38] sm:$0xf]  ;;  %v2004_v61 = vand.u32 127, %v344_v58 }
  0x18   : > { %335 = vst [vmem:[#allocation1] ss:$2 sm:$0xff] %v1901_v3  ;;  %v606_v28 = vld [vmem:[%s2487_s4] sm:$0xf]  ;;  %v1583_v32 = vld [vmem:[%s2488_s5 + $0x4] sm:$0xf] }
  0x19   : > { %v639_v30 = vld [vmem:[%s2488_s5] sm:$0xf]  ;;  %v1597_v33 = vld [vmem:[%s2488_s5 + $0x3c] sm:$0xf]  ;;  %v1584_v34 = vld [vmem:[%s2488_s5 + $0x8] sm:$0xf] }
  0x1a   : > { %v1598_v35 = vld [vmem:[%s2488_s5 + $0x40] sm:$0xf]  ;;  %v1585_v36 = vld [vmem:[%s2488_s5 + $0xc] sm:$0xf]  ;;  %v1599_v38 = vld [vmem:[%s2488_s5 + $0x44] sm:$0xf] }
  0x1b   : > { %v1586_v39 = vld [vmem:[%s2488_s5 + $0x10] sm:$0xf]  ;;  %v1600_v41 = vld [vmem:[%s2488_s5 + $0x48] sm:$0xf]  ;;  %v1587_v42 = vld [vmem:[%s2488_s5 + $0x14] sm:$0xf] }
  0x1c   : > { %v1601_v45 = vld [vmem:[%s2488_s5 + $0x4c] sm:$0xf]  ;;  %v1588_v46 = vld [vmem:[%s2488_s5 + $0x18] sm:$0xf]  ;;  %v1602_v50 = vld [vmem:[%s2488_s5 + $0x50] sm:$0xf] }
  0x1d   : > { %426 = vperm.xlu2 %1691, %v1576_v4   ;;  %v1589_v51 = vld [vmem:[%s2488_s5 + $0x1c] sm:$0xf]  ;;  %v1590_v55 = vld [vmem:[%s2488_s5 + $0x20] sm:$0xf]  ;;  %v1591_v60 = vld [vmem:[%s2488_s5 + $0x24] sm:$0xf] }
  0x1e   : > { %vm346_vm0 = vcmp.lt.s32.totalorder %v2004_v61, 17  ;;  %vm380_vm1 = vcmp.lt.s32.totalorder %v2004_v61, 16  ;;  %vm411_vm2 = vcmp.lt.s32.totalorder %v2004_v61, 15  ;;  %v1592_v4 = vld [vmem:[%s2488_s5 + $0x28] sm:$0xf]  ;;  %vm444_vm3 = vcmp.lt.s32.totalorder %v2004_v61, 1 }
  0x1f   : > { %v336_v5 = vld.sshfl [vmem:[#allocation1] sm:$0xff pattern:$0x75316420]  ;;  %v337_v6 = vld.sshfl [vmem:[#allocation1 + $0x8] sm:$0xff pattern:$0x75316420] }
  0x20   : > { %340 = vrot.lane.b32.xlu0 %v336_v5, %s1759_s17  ;;  %371 = vst [vmem:[#allocation1] ss:$2 sm:$0xff] %v1901_v3  ;;  %v2023_v5 = vld [vmem:[%s2484_s1] sm:$0xff]  ;;  %vm355_vm6 = vcmask 1043456   ;;  %vm488_vm9 = vcmp.lt.s32.totalorder %v2004_v61, 127  ;;  %vm519_vm11 = vcmp.lt.s32.totalorder %v2004_v61, 113 }
  0x21   : > { %vm349_vm4 = vcmp.ge.s32.totalorder %v2023_v5, 1  ;;  %vm552_vm12 = vcmp.lt.s32.totalorder %v2004_v61, 112  ;;  %vm522_vm13 = vcmp.lt.s32.totalorder %v2023_v5, 15  ;;  %vm583_vm14 = vcmp.lt.s32.totalorder %v2004_v61, 111  ;;  %s1776_s26 = smov 45   ;;  %s1779_s29 = smov 3  }
  0x27   : > { %v372_v7 = vld.sshfl [vmem:[#allocation1] sm:$0xff pattern:$0x75316420]  ;;  %v373_v8 = vld.sshfl [vmem:[#allocation1 + $0x8] sm:$0xff pattern:$0x75316420] }
  0x28   : > { %342 = vrot.lane.b32.xlu0 %v337_v6, %s1759_s17  ;;  %376 = vrot.lane.b32.xlu1 %v372_v7, %s1760_s21  ;;  %402 = vst [vmem:[#allocation1] ss:$2 sm:$0xff] %v1901_v3  ;;  %v2028_v6 = vld [vmem:[%s2485_s2] sm:$0xff]  ;;  %v1767_v7 = vmov 839922192   ;;  %s1770_s17 = smov 96  }
  0x29   : > { %378 = vrot.lane.b32.xlu2 %v373_v8, %s1760_s21  ;;  %v365_v8 = vunpack.c.l.s4 %v1767_v7  ;;  %vm350_vm5 = vcmp.ge.s32.totalorder %v2028_v6, 1  ;;  %vm414_vm7 = vcmp.lt.s32.totalorder %v2028_v6, 15  ;;  %s1771_s21 = smov 93  }
  0x2a   : > { %vm2048_vm8 = vmand %vm349_vm4, %vm350_vm5 }
  0x2b   : > { %vm2064_vm10 = vmand %vm349_vm4, %vm414_vm7 }
  0x2c   : > { %vm523_vm15 = vmand %vm522_vm13, %vm350_vm5 }
  0x2f   : > { %v404_v10 = vld.sshfl [vmem:[#allocation1 + $0x8] sm:$0xff pattern:$0x75316420]  ;;  %v403_v11 = vld.sshfl [vmem:[#allocation1] sm:$0xff pattern:$0x75316420] }
  0x30   : > { %409 = vrot.lane.b32.xlu1 %v404_v10, %s1761_s24  ;;  %407 = vrot.lane.b32.xlu0 %v403_v11, %s1761_s24  ;;  %435 = vst [vmem:[#allocation1] ss:$2 sm:$0xff] %v1901_v3  ;;  %s1774_s24 = smov 51  }
  0x31   : > { %457 = vperm.xlu2 %1691, %v1577_v9  }
  0x37   : > { %v436_v13 = vld.sshfl [vmem:[#allocation1] sm:$0xff pattern:$0x75316420]  ;;  %v437_v14 = vld.sshfl [vmem:[#allocation1 + $0x8] sm:$0xff pattern:$0x75316420] }
  0x38   : > { %501 = vperm.xlu1 %1690, %v1579_v12   ;;  %440 = vrot.lane.b32.xlu0 %v436_v13, %s1762_s27  ;;  %479 = vst [vmem:[#allocation1] ss:$2 sm:$0xff] %v1901_v3 }
  0x3f   : > { %v481_v16 = vld.sshfl [vmem:[#allocation1 + $0x8] sm:$0xff pattern:$0x75316420]  ;;  %v480_v17 = vld.sshfl [vmem:[#allocation1] sm:$0xff pattern:$0x75316420] }
  0x40   : > { %442 = vrot.lane.b32.xlu1 %v437_v14, %s1762_s27  ;;  %470 = vperm.xlu0 %1692, %v1578_v15   ;;  %510 = vst [vmem:[#allocation1] ss:$2 sm:$0xff] %v1901_v3  ;;  %s1777_s27 = smov 42  }
  0x41   : > { %486 = vrot.lane.b32.xlu2 %v481_v16, %s1763_s14  ;;  %v2037_v16 = vunpack.c.0.s8 %v365_v8 }
  0x47   : > { %v512_v18 = vld.sshfl [vmem:[#allocation1 + $0x8] sm:$0xff pattern:$0x75316420]  ;;  %v511_v19 = vld.sshfl [vmem:[#allocation1] sm:$0xff pattern:$0x75316420] }
  0x48   : > { %484 = vrot.lane.b32.xlu1 %v480_v17, %s1763_s14  ;;  %517 = vrot.lane.b32.xlu0 %v512_v18, %s1764_s16  ;;  %543 = vst [vmem:[#allocation1] ss:$2 sm:$0xff] %v1901_v3  ;;  %s1768_s14 = smov 102  }
  0x49   : > { %515 = vrot.lane.b32.xlu2 %v511_v19, %s1764_s16  ;;  %s1769_s16 = smov 99  }
  0x4f   : > { %v545_v21 = vld.sshfl [vmem:[#allocation1 + $0x8] sm:$0xff pattern:$0x75316420]  ;;  %v544_v22 = vld.sshfl [vmem:[#allocation1] sm:$0xff pattern:$0x75316420] }
  0x50   : > { %534 = vperm.xlu1 %1690, %v1580_v20   ;;  %550 = vrot.lane.b32.xlu0 %v545_v21, %s1765_s22  ;;  %574 = vst [vmem:[#allocation1] ss:$2 sm:$0xff] %v1901_v3 }
  0x51   : > { %548 = vrot.lane.b32.xlu2 %v544_v22, %s1765_s22  ;;  %s1772_s22 = smov 90  }
  0x57   : > { %v576_v24 = vld.sshfl [vmem:[#allocation1 + $0x8] sm:$0xff pattern:$0x75316420]  ;;  %v575_v25 = vld.sshfl [vmem:[#allocation1] sm:$0xff pattern:$0x75316420] }
  0x58   : > { %565 = vperm.xlu1 %1690, %v1581_v23   ;;  %581 = vrot.lane.b32.xlu0 %v576_v24, %s1766_s25  ;;  %v1593_v24 = vld [vmem:[%s2488_s5 + $0x2c] sm:$0xf] }
  0x59   : > { %579 = vrot.lane.b32.xlu2 %v575_v25, %s1766_s25  ;;  %s1775_s25 = smov 48  }
  0x60   : > { %597 = vperm.xlu1 %1690, %v1582_v26   ;;  %1007 = vperm.xlu0 %1692, %v1594_v27  }
  0x61   : > { %609 = vperm.xlu2 %1691, %v606_v28  }
  0x68   : > { %1038 = vperm.xlu0 %1692, %v1595_v29  }
  0x69   : > { %642 = vperm.xlu2 %1691, %v639_v30  }
  0x6f   : > { %v1962_v37 = vpop.permute.xlu2 %393 }
  0x70   : > { %1069 = vperm.xlu0 %1692, %v1596_v31  }
  0x71   : > { %675 = vperm.xlu2 %1691, %v1583_v32   ;;  %v398_v32 = vperm.slane %v1962_v37, %v2037_v16 }
  0x77   : > { %v1970_v40 = vpop.permute.xlu2 %426 }
  0x78   : > { %1102 = vperm.xlu0 %1692, %v1597_v33  }
  0x79   : > { %706 = vperm.xlu2 %1691, %v1584_v34  }
  0x80   : > { %1134 = vperm.xlu0 %1692, %v1598_v35   ;;  %v431_v35 = vperm.slane %v1970_v40, %v2037_v16 }
  0x81   : > { %739 = vperm.xlu2 %1691, %v1585_v36  }
  0x83   : > { %v379_v47 = vpop.permute.xlu2 %378 }
  0x87   : > { %v1978_v43 = vpop.permute.xlu1 %362 }
  0x88   : > { %1165 = vperm.xlu0 %1692, %v1599_v38   ;;  %v367_v33 = vperm.slane %v1978_v43, %v2037_v16 }
  0x89   : > { %772 = vperm.xlu2 %1691, %v1586_v39  }
  0x8b   : > { %v1992_v52 = vpop.permute.xlu2 %457 }
  0x8c   : > { %v462_v40 = vperm.slane %v1992_v52, %v2037_v16 }
  0x90   : > { %1197 = vperm.xlu0 %1692, %v1600_v41  }
  0x91   : > { %805 = vperm.xlu2 %1691, %v1587_v42  }
  0x92   : > { %v341_v44 = vpop.permute.xlu0 %340 }
  0x98   : > { %1229 = vperm.xlu0 %1692, %v1601_v45  }
  0x99   : > { %837 = vperm.xlu2 %1691, %v1588_v46  }
  0x9a   : > { %v343_v48 = vpop.permute.xlu0 %342  ;;  %v377_v49 = vpop.permute.xlu1 %376 }
  0x9b   : > { %v1999_v59 = vpop.permute.xlu2 %486  ;;  %v347_v1 = vsel %vm346_vm0, %v341_v44, %v343_v48  ;;  %v381_v2 = vsel %vm380_vm1, %v377_v49, %v379_v47  ;;  %v348_v17 = vsel %vm346_vm0, %v343_v48, %v341_v44  ;;  %v382_v18 = vsel %vm380_vm1, %v379_v47, %v377_v49  ;;  %v1604_v49 = vld [vmem:[%s2488_s5 + $0x58] sm:$0xf]  ;;  %vm586_vm0 = vmand %vm522_vm13, %vm414_vm7 }
  0x9c   : > { %v354_v10 = vrot.slane %v347_v1, 4  ;;  %v385_v11 = vrot.slane %v381_v2, 4  ;;  %vm627_vm1 = vcmp.lt.s32.totalorder %v2004_v61, 102 }
  0x9e   : > { %v356_v20 = vsel %vm355_vm6, %v348_v17, %v354_v10  ;;  %v386_v21 = vsel %vm355_vm6, %v382_v18, %v385_v11 }
  0x9f   : > { %v358_v28 = vsel %vm2048_vm8, %v356_v20, 0.0  ;;  %v388_v29 = vsel %vm349_vm4, %v386_v21, 0.0 }
  0xa0   : > { %1262 = vperm.xlu0 %1692, %v1602_v50   ;;  %v369_v41 = vmul.f32 %v367_v33, %v358_v28  ;;  %v400_v42 = vmul.f32 %v398_v32, %v388_v29 }
  0xa1   : > { %868 = vperm.xlu2 %1691, %v1589_v51  }
  0xa2   : > { %v410_v53 = vpop.permute.xlu1 %409  ;;  %v408_v54 = vpop.permute.xlu0 %407  ;;  %v401_v50 = vadd.f32 %v400_v42, %v369_v41 }
  0xa3   : > { %v2011_v0 = vpop.permute.xlu2 %515  ;;  %v412_v9 = vsel %vm411_vm2, %v408_v54, %v410_v53  ;;  %v413_v23 = vsel %vm411_vm2, %v410_v53, %v408_v54  ;;  %vm630_vm2 = vcmp.ge.s32.totalorder %v2023_v5, 6 }
  0xa4   : > { %v418_v15 = vrot.slane %v412_v9, 4 }
  0xa6   : > { %v419_v26 = vsel %vm355_vm6, %v413_v23, %v418_v15 }
  0xa7   : > { %v421_v36 = vsel %vm2064_vm10, %v419_v26, 0.0  ;;  %vm724_vm10 = vcmp.lt.s32.totalorder %v2004_v61, 93 }
  0xa8   : > { %v433_v45 = vmul.f32 %v431_v35, %v421_v36 }
  0xa9   : > { %900 = vperm.xlu2 %1691, %v1590_v55  }
  0xaa   : > { %v1997_v56 = vpop.permute.xlu1 %501  ;;  %v441_v57 = vpop.permute.xlu0 %440  ;;  %v434_v55 = vadd.f32 %v433_v45, %v401_v50 }
  0xab   : > { %v549_v27 = vpop.permute.xlu2 %548 }
  0xb1   : > { %932 = vperm.xlu2 %1691, %v1591_v60  }
  0xb2   : > { %v443_v62 = vpop.permute.xlu1 %442  ;;  %v2006_v63 = vpop.permute.xlu0 %470 }
  0xb3   : > { %v445_v12 = vsel %vm444_vm3, %v441_v57, %v443_v62  ;;  %v446_v30 = vsel %vm444_vm3, %v443_v62, %v441_v57  ;;  %v475_v46 = vperm.slane %v2006_v63, %v2037_v16  ;;  %v580_v57 = vpop.permute.xlu2 %579  ;;  %vm631_vm3 = vcmp.ge.s32.totalorder %v2028_v6, 6 }
  0xb4   : > { %v449_v22 = vrot.slane %v445_v12, 4  ;;  %vm632_vm4 = vmand %vm630_vm2, %vm631_vm3 }
  0xb5   : > { %v477_v60 = vmul.f32 %v475_v46, %v1901_v3 }
  0xb6   : > { %v450_v34 = vsel %vm355_vm6, %v446_v30, %v449_v22 }
  0xb7   : > { %v452_v37 = vsel %vm350_vm5, %v450_v34, 0.0  ;;  %vm660_vm5 = vcmp.lt.s32.totalorder %v2004_v61, 99 }
  0xb8   : > { %v464_v51 = vmul.f32 %v462_v40, %v452_v37 }
  0xb9   : > { %963 = vperm.xlu2 %1691, %v1592_v4  }
  0xba   : > { %v485_v13 = vpop.permute.xlu1 %484  ;;  %v518_v14 = vpop.permute.xlu0 %517  ;;  %v465_v2 = vadd.f32 %v464_v51, %v434_v55 }
  0xbb   : > { %v490_v31 = vsel %vm488_vm9, %v1999_v59, %v485_v13  ;;  %v521_v43 = vsel %vm519_vm11, %v518_v14, %v2011_v0  ;;  %v489_v47 = vsel %vm488_vm9, %v485_v13, %v1999_v59  ;;  %v520_v54 = vsel %vm519_vm11, %v2011_v0, %v518_v14 }
  0xbc   : > { %v493_v44 = vrot.slane %v490_v31, 4  ;;  %v526_v52 = vrot.slane %v521_v43, 4  ;;  %v506_v59 = vperm.slane %v1997_v56, %v2037_v16  ;;  %v478_v14 = vadd.f32 %v477_v60, %v465_v2 }
  0xbd   : > { %vm693_vm9 = vcmp.lt.s32.totalorder %v2004_v61, 96  ;;  %vm727_vm11 = vcmp.lt.s32.totalorder %v2028_v6, 13 }
  0xbe   : > { %v494_v53 = vsel %vm355_vm6, %v489_v47, %v493_v44  ;;  %v527_v4 = vsel %vm355_vm6, %v520_v54, %v526_v52 }
  0xbf   : > { %v496_v62 = vsel %vm414_vm7, %v494_v53, 0.0  ;;  %v529_v12 = vsel %vm523_vm15, %v527_v4, 0.0  ;;  %v1603_v4 = vld [vmem:[%s2488_s5 + $0x54] sm:$0xf]  ;;  %vm663_vm7 = vcmp.ge.s32.totalorder %v2028_v6, 3 }
  0xc0   : > { %v508_v8 = vmul.f32 %v506_v59, %v496_v62  ;;  %vm664_vm8 = vmand %vm630_vm2, %vm663_vm7 }
  0xc1   : > { %994 = vperm.xlu2 %1691, %v1593_v24   ;;  %v610_v24 = vpop.permute.xlu2 %609 }
  0xc2   : > { %v535_v38 = vpop.permute.xlu1 %534  ;;  %v551_v39 = vpop.permute.xlu0 %550  ;;  %v509_v18 = vadd.f32 %v508_v8, %v478_v14  ;;  %v614_v28 = vperm.slane %v610_v24, %v2037_v16 }
  0xc3   : > { %v554_v48 = vsel %vm552_vm12, %v551_v39, %v549_v27  ;;  %v553_v63 = vsel %vm552_vm12, %v549_v27, %v551_v39  ;;  %v539_v56 = vperm.slane %v535_v38, %v2037_v16  ;;  %vm728_vm12 = vmand %vm630_vm2, %vm727_vm11 }
  0xc4   : > { %v557_v58 = vrot.slane %v554_v48, 4 }
  0xc5   : > { %v541_v15 = vmul.f32 %v539_v56, %v529_v12 }
  0xc6   : > { %v558_v9 = vsel %vm355_vm6, %v553_v63, %v557_v58 }
  0xc7   : > { %v560_v17 = vsel %vm522_vm13, %v558_v9, 0.0  ;;  %v542_v22 = vadd.f32 %v541_v15, %v509_v18  ;;  %vm757_vm13 = vcmp.lt.s32.totalorder %v2004_v61, 90 }
  0xc9   : > { %1325 = vperm.xlu2 %1691, %v1604_v49   ;;  %v643_v54 = vpop.permute.xlu2 %642 }
  0xca   : > { %v566_v0 = vpop.permute.xlu1 %565  ;;  %v582_v1 = vpop.permute.xlu0 %581 }
  0xcb   : > { %v585_v7 = vsel %vm583_vm14, %v582_v1, %v580_v57  ;;  %v570_v10 = vperm.slane %v566_v0, %v2037_v16  ;;  %v584_v13 = vsel %vm583_vm14, %v580_v57, %v582_v1  ;;  %vm760_vm14 = vcmp.lt.s32.totalorder %v2028_v6, 10 }
  0xcc   : > { %v589_v11 = vrot.slane %v585_v7, 4  ;;  %vm761_vm15 = vmand %vm630_vm2, %vm760_vm14 }
  0xcd   : > { %v572_v19 = vmul.f32 %v570_v10, %v560_v17 }
  0xce   : > { %v590_v20 = vsel %vm355_vm6, %v584_v13, %v589_v11 }
  0xcf   : > { %v592_v25 = vsel %vm586_vm0, %v590_v20, 0.0  ;;  %v573_v26 = vadd.f32 %v572_v19, %v542_v22  ;;  %v647_v22 = vperm.slane %v643_v54, %v2037_v16  ;;  %vm790_vm0 = vcmp.lt.s32.totalorder %v2004_v61, 54 }
  0xd1   : > { %v2166_v62 = vpop.permute.xlu2 %675 }
  0xd2   : > { %v598_v21 = vpop.permute.xlu1 %597  ;;  %v2147_v41 = vpop.permute.xlu0 %1007 }
  0xd3   : > { %v602_v23 = vperm.slane %v598_v21, %v2037_v16 }
  0xd5   : > { %v604_v27 = vmul.f32 %v602_v23, %v592_v25 }
  0xd7   : > { %v605_v29 = vadd.f32 %v604_v27, %v573_v26 }
  0xd9   : > { %v2140_v30 = vadd.f32 %v614_v28, %v605_v29  ;;  %v2171_v2 = vpop.permute.xlu2 %706 }
  0xda   : > { %v2150_v37 = vpop.permute.xlu0 %1038 }
  0xdb   : > { %618 = vst [vmem:[#allocation1] ss:$2 sm:$0xff] %v2140_v30 }
  0xe1   : > { %v2179_v9 = vpop.permute.xlu2 %739 }
  0xe2   : > { %v620_v31 = vld.sshfl [vmem:[#allocation1 + $0x8] sm:$0xff pattern:$0x75316420]  ;;  %v619_v32 = vld.sshfl [vmem:[#allocation1] sm:$0xff pattern:$0x75316420]  ;;  %v2153_v45 = vpop.permute.xlu0 %1069 }
  0xe3   : > { %625 = vrot.lane.b32.xlu1 %v620_v31, %s1768_s14  ;;  %623 = vrot.lane.b32.xlu0 %v619_v32, %s1768_s14  ;;  %651 = vst [vmem:[#allocation1] ss:$2 sm:$0xff] %v2140_v30 }
  0xe9   : > { %v2184_v13 = vpop.permute.xlu2 %772 }
  0xea   : > { %v653_v33 = vld.sshfl [vmem:[#allocation1 + $0x8] sm:$0xff pattern:$0x75316420]  ;;  %v652_v34 = vld.sshfl [vmem:[#allocation1] sm:$0xff pattern:$0x75316420]  ;;  %v2156_v50 = vpop.permute.xlu0 %1102 }
  0xeb   : > { %658 = vrot.lane.b32.xlu1 %v653_v33, %s1769_s16  ;;  %656 = vrot.lane.b32.xlu0 %v652_v34, %s1769_s16  ;;  %684 = vst [vmem:[#allocation1] ss:$2 sm:$0xff] %v2140_v30 }
  0xf1   : > { %v2197_v28 = vpop.permute.xlu2 %805 }
  0xf2   : > { %v686_v35 = vld.sshfl [vmem:[#allocation1 + $0x8] sm:$0xff pattern:$0x75316420]  ;;  %v685_v36 = vld.sshfl [vmem:[#allocation1] sm:$0xff pattern:$0x75316420]  ;;  %v2160_v52 = vpop.permute.xlu0 %1134 }
  0xf3   : > { %691 = vrot.lane.b32.xlu1 %v686_v35, %s1770_s17  ;;  %689 = vrot.lane.b32.xlu0 %v685_v36, %s1770_s17  ;;  %715 = vst [vmem:[#allocation1] ss:$2 sm:$0xff] %v2140_v30  ;;  %s1780_s17 = smov 125   ;;  %v680_v35 = vperm.slane %v2166_v62, %v2037_v16 }
  0xfa   : > { %v717_v38 = vld.sshfl [vmem:[#allocation1 + $0x8] sm:$0xff pattern:$0x75316420]  ;;  %v716_v39 = vld.sshfl [vmem:[#allocation1] sm:$0xff pattern:$0x75316420]  ;;  %v2163_v58 = vpop.permute.xlu0 %1165 }
  0xfb   : > { %722 = vrot.lane.b32.xlu1 %v717_v38, %s1771_s21  ;;  %720 = vrot.lane.b32.xlu0 %v716_v39, %s1771_s21  ;;  %748 = vst [vmem:[#allocation1] ss:$2 sm:$0xff] %v2140_v30  ;;  %s1781_s21 = smov 122  }
 0x102   : > { %v750_v42 = vld.sshfl [vmem:[#allocation1 + $0x8] sm:$0xff pattern:$0x75316420]  ;;  %v749_v44 = vld.sshfl [vmem:[#allocation1] sm:$0xff pattern:$0x75316420]  ;;  %v2168_v63 = vpop.permute.xlu0 %1197 }
 0x103   : > { %755 = vrot.lane.b32.xlu1 %v750_v42, %s1772_s22  ;;  %753 = vrot.lane.b32.xlu0 %v749_v44, %s1772_s22  ;;  %781 = vst [vmem:[#allocation1] ss:$2 sm:$0xff] %v2140_v30  ;;  %s1782_s22 = smov 86  }
 0x10a   : > { %v783_v43 = vld.sshfl [vmem:[#allocation1 + $0x8] sm:$0xff pattern:$0x75316420]  ;;  %v782_v40 = vld.sshfl [vmem:[#allocation1] sm:$0xff pattern:$0x75316420]  ;;  %v2176_v8 = vpop.permute.xlu0 %1229 }
 0x10b   : > { %788 = vrot.lane.b32.xlu1 %v783_v43, %s1773_s23  ;;  %786 = vrot.lane.b32.xlu0 %v782_v40, %s1773_s23  ;;  %814 = vst [vmem:[#allocation1] ss:$2 sm:$0xff] %v2140_v30  ;;  %s1783_s23 = smov 83  }
 0x112   : > { %v816_v46 = vld.sshfl [vmem:[#allocation1 + $0x8] sm:$0xff pattern:$0x75316420]  ;;  %v815_v47 = vld.sshfl [vmem:[#allocation1] sm:$0xff pattern:$0x75316420]  ;;  %v2182_v12 = vpop.permute.xlu0 %1262 }
 0x113   : > { %821 = vrot.lane.b32.xlu1 %v816_v46, %s1774_s24  ;;  %819 = vrot.lane.b32.xlu0 %v815_v47, %s1774_s24  ;;  %846 = vst [vmem:[#allocation1] ss:$2 sm:$0xff] %v2140_v30  ;;  %s1784_s24 = smov 80   ;;  %v2210_v47 = vpop.permute.xlu2 %837 }
 0x11a   : > { %v848_v48 = vld.sshfl [vmem:[#allocation1 + $0x8] sm:$0xff pattern:$0x75316420]  ;;  %v847_v49 = vld.sshfl [vmem:[#allocation1] sm:$0xff pattern:$0x75316420] }
 0x11b   : > { %853 = vrot.lane.b32.xlu1 %v848_v48, %s1775_s25  ;;  %851 = vrot.lane.b32.xlu0 %v847_v49, %s1775_s25  ;;  %877 = vst [vmem:[#allocation1] ss:$2 sm:$0xff] %v2140_v30  ;;  %s1785_s25 = smov 77  }
 0x122   : > { %v879_v51 = vld.sshfl [vmem:[#allocation1 + $0x8] sm:$0xff pattern:$0x75316420]  ;;  %v878_v53 = vld.sshfl [vmem:[#allocation1] sm:$0xff pattern:$0x75316420] }
 0x123   : > { %884 = vrot.lane.b32.xlu1 %v879_v51, %s1776_s26  ;;  %882 = vrot.lane.b32.xlu0 %v878_v53, %s1776_s26  ;;  %909 = vst [vmem:[#allocation1] ss:$2 sm:$0xff] %v2140_v30  ;;  %v711_v53 = vperm.slane %v2171_v2, %v2037_v16  ;;  %s1786_s26 = smov 74  }
 0x12a   : > { %v911_v55 = vld.sshfl [vmem:[#allocation1 + $0x8] sm:$0xff pattern:$0x75316420]  ;;  %v910_v57 = vld.sshfl [vmem:[#allocation1] sm:$0xff pattern:$0x75316420] }
 0x12b   : > { %916 = vrot.lane.b32.xlu1 %v911_v55, %s1777_s27  ;;  %914 = vrot.lane.b32.xlu0 %v910_v57, %s1777_s27  ;;  %941 = vst [vmem:[#allocation1] ss:$2 sm:$0xff] %v2140_v30  ;;  %s1787_s27 = smov 38  }
 0x132   : > { %v943_v59 = vld.sshfl [vmem:[#allocation1 + $0x8] sm:$0xff pattern:$0x75316420]  ;;  %v942_v60 = vld.sshfl [vmem:[#allocation1] sm:$0xff pattern:$0x75316420] }
 0x133   : > { %948 = vrot.lane.b32.xlu1 %v943_v59, %s1778_s28  ;;  %946 = vrot.lane.b32.xlu0 %v942_v60, %s1778_s28  ;;  %972 = vst [vmem:[#allocation1] ss:$2 sm:$0xff] %v2140_v30  ;;  %s1788_s28 = smov 35  }
 0x13a   : > { %v974_v0 = vld.sshfl [vmem:[#allocation1 + $0x8] sm:$0xff pattern:$0x75316420]  ;;  %v973_v1 = vld.sshfl [vmem:[#allocation1] sm:$0xff pattern:$0x75316420] }
 0x13b   : > { %979 = vrot.lane.b32.xlu1 %v974_v0, %s1779_s29  ;;  %977 = vrot.lane.b32.xlu0 %v973_v1, %s1779_s29  ;;  %1016 = vst [vmem:[#allocation1] ss:$2 sm:$0xff] %v2140_v30  ;;  %s1789_s29 = smov 32  }
 0x142   : > { %v1018_v56 = vld.sshfl [vmem:[#allocation1 + $0x8] sm:$0xff pattern:$0x75316420]  ;;  %v1017_v7 = vld.sshfl [vmem:[#allocation1] sm:$0xff pattern:$0x75316420] }
 0x143   : > { %1294 = vperm.xlu0 %1692, %v1603_v4   ;;  %1023 = vrot.lane.b32.xlu2 %v1018_v56, %s1780_s17  ;;  %1047 = vst [vmem:[#allocation1] ss:$2 sm:$0xff] %v2140_v30  ;;  %v2226_v56 = vpop.permute.xlu2 %868 }
 0x144   : > { %1021 = vrot.lane.b32.xlu1 %v1017_v7, %s1780_s17  ;;  %s1790_s17 = smov 29  }
 0x14a   : > { %v1049_v10 = vld.sshfl [vmem:[#allocation1 + $0x8] sm:$0xff pattern:$0x75316420]  ;;  %v1048_v11 = vld.sshfl [vmem:[#allocation1] sm:$0xff pattern:$0x75316420] }
 0x14b   : > { %1054 = vrot.lane.b32.xlu2 %v1049_v10, %s1781_s21  ;;  %1078 = vst [vmem:[#allocation1] ss:$2 sm:$0xff] %v2140_v30  ;;  %v744_v10 = vperm.slane %v2179_v9, %v2037_v16 }
 0x14c   : > { %1052 = vrot.lane.b32.xlu1 %v1048_v11, %s1781_s21 }
 0x152   : > { %v1080_v14 = vld.sshfl [vmem:[#allocation1 + $0x8] sm:$0xff pattern:$0x75316420]  ;;  %v1079_v15 = vld.sshfl [vmem:[#allocation1] sm:$0xff pattern:$0x75316420] }
 0x153   : > { %1085 = vrot.lane.b32.xlu2 %v1080_v14, %s1782_s22  ;;  %1111 = vst [vmem:[#allocation1] ss:$2 sm:$0xff] %v2140_v30 }
 0x154   : > { %1083 = vrot.lane.b32.xlu1 %v1079_v15, %s1782_s22 }
 0x155   : > { %v626_v17 = vpop.permute.xlu1 %625  ;;  %v624_v18 = vpop.permute.xlu0 %623 }
 0x156   : > { %v628_v19 = vsel %vm627_vm1, %v624_v18, %v626_v17  ;;  %v629_v20 = vsel %vm627_vm1, %v626_v17, %v624_v18  ;;  %vm793_vm1 = vcmp.ge.s32.totalorder %v2023_v5, 3 }
 0x157   : > { %v635_v21 = vrot.slane %v628_v19, 4 }
 0x159   : > { %v636_v23 = vsel %vm355_vm6, %v629_v20, %v635_v21 }
 0x15a   : > { %v638_v24 = vsel %vm632_vm4, %v636_v23, 0.0  ;;  %v1113_v25 = vld.sshfl [vmem:[#allocation1 + $0x8] sm:$0xff pattern:$0x75316420]  ;;  %vm823_vm4 = vcmp.lt.s32.totalorder %v2004_v61, 51 }
 0x15b   : > { %v649_v26 = vmul.f32 %v647_v22, %v638_v24  ;;  %1118 = vrot.lane.b32.xlu2 %v1113_v25, %s1783_s23  ;;  %v1112_v27 = vld.sshfl [vmem:[#allocation1] sm:$0xff pattern:$0x75316420]  ;;  %v777_v24 = vperm.slane %v2184_v13, %v2037_v16 }
 0x15c   : > { %1116 = vrot.lane.b32.xlu1 %v1112_v27, %s1783_s23  ;;  %1143 = vst [vmem:[#allocation1] ss:$2 sm:$0xff] %v2140_v30  ;;  %s1791_s23 = smov 26  }
 0x15d   : > { %v659_v29 = vpop.permute.xlu1 %658  ;;  %v657_v31 = vpop.permute.xlu0 %656 }
 0x15e   : > { %v661_v32 = vsel %vm660_vm5, %v657_v31, %v659_v29  ;;  %v662_v33 = vsel %vm660_vm5, %v659_v29, %v657_v31  ;;  %vm826_vm5 = vmand %vm793_vm1, %vm663_vm7 }
 0x15f   : > { %v667_v34 = vrot.slane %v661_v32, 4 }
 0x161   : > { %v668_v36 = vsel %vm355_vm6, %v662_v33, %v667_v34 }
 0x162   : > { %v670_v38 = vsel %vm664_vm8, %v668_v36, 0.0  ;;  %vm855_vm8 = vcmp.lt.s32.totalorder %v2004_v61, 48 }
 0x163   : > { %v682_v39 = vmul.f32 %v680_v35, %v670_v38  ;;  %v1145_v42 = vld.sshfl [vmem:[#allocation1 + $0x8] sm:$0xff pattern:$0x75316420]  ;;  %v1144_v44 = vld.sshfl [vmem:[#allocation1] sm:$0xff pattern:$0x75316420] }
 0x164   : > { %1150 = vrot.lane.b32.xlu2 %v1145_v42, %s1784_s24  ;;  %1148 = vrot.lane.b32.xlu1 %v1144_v44, %s1784_s24  ;;  %1174 = vst [vmem:[#allocation1] ss:$2 sm:$0xff] %v2140_v30 }
 0x165   : > { %v683_v43 = vadd.f32 %v682_v39, %v649_v26  ;;  %v692_v40 = vpop.permute.xlu1 %691  ;;  %v690_v46 = vpop.permute.xlu0 %689  ;;  %v810_v39 = vperm.slane %v2197_v28, %v2037_v16 }
 0x166   : > { %v694_v48 = vsel %vm693_vm9, %v690_v46, %v692_v40  ;;  %v695_v51 = vsel %vm693_vm9, %v692_v40, %v690_v46  ;;  %v2243_v26 = vpop.permute.xlu2 %900  ;;  %vm886_vm9 = vcmp.lt.s32.totalorder %v2004_v61, 45 }
 0x167   : > { %v698_v49 = vrot.slane %v694_v48, 4 }
 0x169   : > { %v699_v54 = vsel %vm355_vm6, %v695_v51, %v698_v49 }
 0x16a   : > { %v701_v55 = vsel %vm630_vm2, %v699_v54, 0.0  ;;  %vm794_vm2 = vmand %vm793_vm1, %vm631_vm3 }
 0x16b   : > { %v713_v57 = vmul.f32 %v711_v53, %v701_v55  ;;  %v1176_v59 = vld.sshfl [vmem:[#allocation1 + $0x8] sm:$0xff pattern:$0x75316420]  ;;  %v1175_v60 = vld.sshfl [vmem:[#allocation1] sm:$0xff pattern:$0x75316420] }
 0x16c   : > { %1181 = vrot.lane.b32.xlu2 %v1176_v59, %s1785_s25  ;;  %1179 = vrot.lane.b32.xlu1 %v1175_v60, %s1785_s25  ;;  %1206 = vst [vmem:[#allocation1] ss:$2 sm:$0xff] %v2140_v30 }
 0x16d   : > { %v714_v62 = vadd.f32 %v713_v57, %v683_v43  ;;  %v723_v0 = vpop.permute.xlu1 %722  ;;  %v721_v1 = vpop.permute.xlu0 %720  ;;  %v842_v57 = vperm.slane %v2210_v47, %v2037_v16 }
 0x16e   : > { %v725_v2 = vsel %vm724_vm10, %v721_v1, %v723_v0  ;;  %v726_v7 = vsel %vm724_vm10, %v723_v0, %v721_v1  ;;  %v2256_v48 = vpop.permute.xlu2 %932  ;;  %vm889_vm10 = vmand %vm793_vm1, %vm727_vm11 }
 0x16f   : > { %v731_v4 = vrot.slane %v725_v2, 4 }
 0x171   : > { %v732_v11 = vsel %vm355_vm6, %v726_v7, %v731_v4 }
 0x172   : > { %v734_v14 = vsel %vm728_vm12, %v732_v11, 0.0  ;;  %vm918_vm12 = vcmp.lt.s32.totalorder %v2004_v61, 42 }
 0x173   : > { %v746_v15 = vmul.f32 %v744_v10, %v734_v14  ;;  %v1208_v17 = vld.sshfl [vmem:[#allocation1 + $0x8] sm:$0xff pattern:$0x75316420]  ;;  %v1207_v18 = vld.sshfl [vmem:[#allocation1] sm:$0xff pattern:$0x75316420] }
 0x174   : > { %1213 = vrot.lane.b32.xlu2 %v1208_v17, %s1786_s26  ;;  %1211 = vrot.lane.b32.xlu1 %v1207_v18, %s1786_s26  ;;  %1238 = vst [vmem:[#allocation1] ss:$2 sm:$0xff] %v2140_v30  ;;  %v1605_v18 = vld [vmem:[%s2488_s5 + $0x5c] sm:$0xf]  ;;  %s323_s26 = sand.u32 1, %s1748_s10  }
 0x175   : > { %v747_v19 = vadd.f32 %v746_v15, %v714_v62  ;;  %v756_v20 = vpop.permute.xlu1 %755  ;;  %v754_v21 = vpop.permute.xlu0 %753  ;;  %v873_v15 = vperm.slane %v2226_v56, %v2037_v16 }
 0x176   : > { %v758_v22 = vsel %vm757_vm13, %v754_v21, %v756_v20  ;;  %v759_v23 = vsel %vm757_vm13, %v756_v20, %v754_v21  ;;  %v2268_v10 = vpop.permute.xlu2 %963  ;;  %vm921_vm13 = vmand %vm793_vm1, %vm760_vm14 }
 0x177   : > { %v764_v9 = vrot.slane %v758_v22, 4 }
 0x179   : > { %v765_v25 = vsel %vm355_vm6, %v759_v23, %v764_v9 }
 0x17a   : > { %v767_v27 = vsel %vm761_vm15, %v765_v25, 0.0  ;;  %vm950_vm15 = vcmp.lt.s32.totalorder %v2004_v61, 6 }
 0x17b   : > { %v779_v29 = vmul.f32 %v777_v24, %v767_v27  ;;  %v1240_v31 = vld.sshfl [vmem:[#allocation1 + $0x8] sm:$0xff pattern:$0x75316420]  ;;  %v1239_v32 = vld.sshfl [vmem:[#allocation1] sm:$0xff pattern:$0x75316420] }
 0x17c   : > { %1245 = vrot.lane.b32.xlu2 %v1240_v31, %s1787_s27  ;;  %1243 = vrot.lane.b32.xlu1 %v1239_v32, %s1787_s27  ;;  %1271 = vst [vmem:[#allocation1] ss:$2 sm:$0xff] %v2140_v30  ;;  %v905_v31 = vperm.slane %v2243_v26, %v2037_v16  ;;  %s1572_s27 = sshll.u32 %s323_s26, 3 }
 0x17d   : > { %v780_v33 = vadd.f32 %v779_v29, %v747_v19  ;;  %v789_v34 = vpop.permute.xlu1 %788  ;;  %v787_v13 = vpop.permute.xlu0 %786 }
 0x17e   : > { %v791_v35 = vsel %vm790_vm0, %v787_v13, %v789_v34  ;;  %v792_v38 = vsel %vm790_vm0, %v789_v34, %v787_v13  ;;  %v995_v27 = vpop.permute.xlu2 %994  ;;  %vm981_vm0 = vcmp.lt.s32.totalorder %v2004_v61, 3 }
 0x17f   : > { %v797_v36 = vrot.slane %v791_v35, 4 }
 0x181   : > { %v798_v42 = vsel %vm355_vm6, %v792_v38, %v797_v36 }
 0x182   : > { %v800_v44 = vsel %vm794_vm2, %v798_v42, 0.0  ;;  %vm1056_vm2 = vcmp.lt.s32.totalorder %v2004_v61, 122 }
 0x183   : > { %v812_v43 = vmul.f32 %v810_v39, %v800_v44  ;;  %v1273_v40 = vld.sshfl [vmem:[#allocation1 + $0x8] sm:$0xff pattern:$0x75316420]  ;;  %v1272_v46 = vld.sshfl [vmem:[#allocation1] sm:$0xff pattern:$0x75316420] }
 0x184   : > { %1278 = vrot.lane.b32.xlu2 %v1273_v40, %s1788_s28  ;;  %1276 = vrot.lane.b32.xlu1 %v1272_v46, %s1788_s28  ;;  %1303 = vst [vmem:[#allocation1] ss:$2 sm:$0xff] %v2140_v30  ;;  %v937_v40 = vperm.slane %v2256_v48, %v2037_v16  ;;  %s1616_s28 = sshll.u32 %s1863_s13, 3  ;;  %s1493_s13 = scalar_lea.sflag [#allocation3], %s323_s26 }
 0x185   : > { %v813_v49 = vadd.f32 %v812_v43, %v780_v33  ;;  %v822_v51 = vpop.permute.xlu1 %821  ;;  %v820_v53 = vpop.permute.xlu0 %819  ;;  %v1409_v33 = vld [vmem:[%s2490_s7] sm:$0xf]  ;;  %s1504_s16 = scalar_lea.hbm %s2492_s9, %s1616_s28 }
 0x186   : > { %v824_v54 = vsel %vm823_vm4, %v820_v53, %v822_v51  ;;  %v825_v55 = vsel %vm823_vm4, %v822_v51, %v820_v53  ;;  %v1398_v51 = vld [vmem:[%s2489_s6] sm:$0xf]  ;;  %v2308_v53 = vpop.permute.xlu2 %1325  ;;  %vm1087_vm4 = vcmp.lt.s32.totalorder %v2004_v61, 86  ;;  %s1508_s22 = sshll.u32 %s1504_s16, 4  ;;  %s1509_s22 = int_to_ptr.hbm [resolvable:$true] %s1508_s22 }
 0x187   : > { %v829_v28 = vrot.slane %v824_v54, 4 }
 0x189   : > { %v830_v59 = vsel %vm355_vm6, %v825_v55, %v829_v28  ;;  %v1606_v28 = vld [vmem:[%s2488_s5 + $0x60] sm:$0xf] }
 0x18a   : > { %v832_v60 = vsel %vm826_vm5, %v830_v59, 0.0  ;;  %vm1090_vm5 = vcmp.lt.s32.totalorder %v2023_v5, 13 }
 0x18b   : > { %v844_v62 = vmul.f32 %v842_v57, %v832_v60  ;;  %v1305_v0 = vld.sshfl [vmem:[#allocation1 + $0x8] sm:$0xff pattern:$0x75316420]  ;;  %v1304_v1 = vld.sshfl [vmem:[#allocation1] sm:$0xff pattern:$0x75316420] }
 0x18c   : > { %1310 = vrot.lane.b32.xlu2 %v1305_v0, %s1789_s29  ;;  %1308 = vrot.lane.b32.xlu1 %v1304_v1, %s1789_s29  ;;  %1334 = vst [vmem:[#allocation1] ss:$2 sm:$0xff] %v2140_v30  ;;  %v968_v1 = vperm.slane %v2268_v10, %v2037_v16 }
 0x18d   : > { %v845_v2 = vadd.f32 %v844_v62, %v813_v49  ;;  %v854_v4 = vpop.permute.xlu1 %853  ;;  %v852_v7 = vpop.permute.xlu0 %851  ;;  %v1609_v49 = vld [vmem:[%s2490_s7 + $0xc] sm:$0xf] }
 0x18e   : > { %v856_v11 = vsel %vm855_vm8, %v852_v7, %v854_v4  ;;  %v857_v14 = vsel %vm855_vm8, %v854_v4, %v852_v7  ;;  %v1608_v4 = vld [vmem:[%s2490_s7 + $0x8] sm:$0xf]  ;;  %vm1091_vm8 = vmand %vm1090_vm5, %vm631_vm3 }
 0x18f   : > { %v860_v47 = vrot.slane %v856_v11, 4 }
 0x191   : > { %v861_v17 = vsel %vm355_vm6, %v857_v14, %v860_v47  ;;  %v1607_v47 = vld [vmem:[%s2490_s7 + $0x4] sm:$0xf] }
 0x192   : > { %v863_v19 = vsel %vm793_vm1, %v861_v17, 0.0  ;;  %vm1025_vm1 = vcmp.lt.s32.totalorder %v2004_v61, 125 }
 0x193   : > { %v875_v20 = vmul.f32 %v873_v15, %v863_v19  ;;  %v1336_v21 = vld.sshfl [vmem:[#allocation1 + $0x8] sm:$0xff pattern:$0x75316420]  ;;  %v1335_v22 = vld.sshfl [vmem:[#allocation1] sm:$0xff pattern:$0x75316420] }
 0x194   : > { %1357 = vperm.xlu2 %1691, %v1605_v18   ;;  %1341 = vrot.lane.b32.xlu1 %v1336_v21, %s1790_s17  ;;  %1366 = vst [vmem:[#allocation1] ss:$2 sm:$0xff] %v2140_v30  ;;  %v999_v21 = vperm.slane %v995_v27, %v2037_v16 }
 0x195   : > { %v876_v56 = vadd.f32 %v875_v20, %v845_v2  ;;  %1339 = vrot.lane.b32.xlu0 %v1335_v22, %s1790_s17  ;;  %v885_v9 = vpop.permute.xlu1 %884  ;;  %v883_v23 = vpop.permute.xlu0 %882  ;;  %s325_s17 = scalar_lea.vmem [#allocation2], %s1572_s27  ;;  %s1714_s27 = scalar_lea.hbm %s2492_s9, 16 }
 0x196   : > { %v887_v24 = vsel %vm886_vm9, %v883_v23, %v885_v9  ;;  %v888_v29 = vsel %vm886_vm9, %v885_v9, %v883_v23  ;;  %v1477_v9 = vld [vmem:[%s2491_s8] sm:$0xf]  ;;  %v1012_v23 = vperm.slane %v2147_v41, %v2037_v16  ;;  %vm1120_vm9 = vcmp.lt.s32.totalorder %v2004_v61, 83  ;;  %s1506_s21 = sshll.u32 %s325_s17, 4  ;;  %s1507_s21 = int_to_ptr.vmem [resolvable:$true] %s1506_s21 }
 0x197   : > { %v892_v25 = vrot.slane %v887_v24, 4 }
 0x199   : > { %v893_v32 = vsel %vm355_vm6, %v888_v29, %v892_v25  ;;  %v1014_v29 = vmul.f32 %v1012_v23, %v2140_v30 }
 0x19a   : > { %v895_v34 = vsel %vm889_vm10, %v893_v32, 0.0  ;;  %vm1123_vm10 = vmand %vm1090_vm5, %vm663_vm7 }
 0x19b   : > { %v907_v13 = vmul.f32 %v905_v31, %v895_v34  ;;  %v1368_v35 = vld.sshfl [vmem:[#allocation1 + $0x8] sm:$0xff pattern:$0x75316420]  ;;  %v1367_v36 = vld.sshfl [vmem:[#allocation1] sm:$0xff pattern:$0x75316420] }
 0x19c   : > { %1412 = vperm.xlu2 %1691, %v1409_v33   ;;  %1373 = vrot.lane.b32.xlu1 %v1368_v35, %s1791_s23  ;;  %v1043_v35 = vperm.slane %v2150_v37, %v2037_v16 }
 0x19d   : > { %v908_v38 = vadd.f32 %v907_v13, %v876_v56  ;;  %1371 = vrot.lane.b32.xlu0 %v1367_v36, %s1791_s23  ;;  %v917_v39 = vpop.permute.xlu1 %916  ;;  %v915_v42 = vpop.permute.xlu0 %914  ;;  %s1708_s23 = sshra.s32 %s1509_s22, 4  ;;  %s1709_s23 = int_to_ptr.hbm [resolvable:$true] %s1708_s23 }
 0x19e   : > { %v919_v26 = vsel %vm918_vm12, %v915_v42, %v917_v39  ;;  %v920_v43 = vsel %vm918_vm12, %v917_v39, %v915_v42  ;;  %v1024_v7 = vpop.permute.xlu2 %1023  ;;  %vm1152_vm12 = vcmp.lt.s32.totalorder %v2004_v61, 80  ;;  %s1710_s24 = scalar_lea.hbm %s1709_s23, 8  ;;  %p1715_p0 = scmp.lt.s32.totalorder %s1709_s23, %s2492_s9 }
 0x19f   : > { %v924_v44 = vrot.slane %v919_v26, 4  ;;  %p1711_p11 = scmp.ne.s32.totalorder %s1709_s23, %s1710_s24  ;;  %p1716_p1 = scmp.lt.s32.totalorder %s1714_s27, %s1710_s24 }
 0x1a1   : > { %v925_v46 = vsel %vm355_vm6, %v920_v43, %v924_v44  ;;  %p1712_p12 = pnand %p1711_p11, %p1880_p5  ;;  %p1717_p2 = por %p1716_p1, %p1715_p0 }
 0x1a2   : > { %v927_v54 = vsel %vm921_vm13, %v925_v46, 0.0  ;;  %vm1183_vm13 = vcmp.lt.s32.totalorder %v2004_v61, 77 }
 0x1a3   : > { %v939_v55 = vmul.f32 %v937_v40, %v927_v54  ;;  %v1074_v40 = vperm.slane %v2153_v45, %v2037_v16  ;;  %p1713_p13 = pneg %p1712_p12 }
 0x1a4   : > { %1464 = vperm.xlu2 %1691, %v1609_v49   ;;  %1401 = vperm.xlu1 %1690, %v1398_v51  }
 0x1a5   : > { %v940_v48 = vadd.f32 %v939_v55, %v908_v38  ;;  %1389 = vperm.xlu0 %1692, %v1606_v28   ;;  %v949_v57 = vpop.permute.xlu1 %948  ;;  %v947_v59 = vpop.permute.xlu0 %946  ;;  %p1718_p3 = pnand %p1717_p2, %p1713_p13 }
 0x1a6   : > { %v951_v60 = vsel %vm950_vm15, %v947_v59, %v949_v57  ;;  %v952_v0 = vsel %vm950_vm15, %v949_v57, %v947_v59  ;;  %v1055_v25 = vpop.permute.xlu2 %1054  ;;  %v1107_v57 = vperm.slane %v2156_v50, %v2037_v16  ;;  %vm1186_vm15 = vmand %vm1090_vm5, %vm727_vm11 }
 0x1a7   : > { %v955_v62 = vrot.slane %v951_v60, 4 }
 0x1a9   : > { %v956_v2 = vsel %vm355_vm6, %v952_v0, %v955_v62 }
 0x1aa   : > { %v958_v11 = vsel %vm631_vm3, %v956_v2, 0.0 }
 0x1ab   : > { %v970_v14 = vmul.f32 %v968_v1, %v958_v11  ;;  %v1139_v11 = vperm.slane %v2160_v52, %v2037_v16 }
 0x1ac   : > { %1447 = vperm.xlu1 %1690, %v1608_v4  }
 0x1ad   : > { %v971_v15 = vadd.f32 %v970_v14, %v940_v48  ;;  %1430 = vperm.xlu0 %1692, %v1607_v47   ;;  %v980_v10 = vpop.permute.xlu1 %979  ;;  %v978_v17 = vpop.permute.xlu0 %977 }
 0x1ae   : > { %v982_v18 = vsel %vm981_vm0, %v978_v17, %v980_v10  ;;  %v983_v20 = vsel %vm981_vm0, %v980_v10, %v978_v17  ;;  %v1086_v39 = vpop.permute.xlu2 %1085  ;;  %vm1215_vm0 = vcmp.lt.s32.totalorder %v2004_v61, 74 }
 0x1af   : > { %v986_v19 = vrot.slane %v982_v18, 4 }
 0x1b1   : > { %v987_v22 = vsel %vm355_vm6, %v983_v20, %v986_v19 }
 0x1b2   : > { %v989_v56 = vsel %vm663_vm7, %v987_v22, 0.0 }
 0x1b3   : > { %v1001_v24 = vmul.f32 %v999_v21, %v989_v56  ;;  %v1170_v21 = vperm.slane %v2163_v58, %v2037_v16  ;;  %v1202_v58 = vperm.slane %v2168_v63, %v2037_v16  ;;  %v1234_v63 = vperm.slane %v2176_v8, %v2037_v16 }
 0x1b5   : > { %v1002_v31 = vadd.f32 %v1001_v24, %v971_v15  ;;  %1480 = vperm.xlu0 %1692, %v1477_v9  }
 0x1b6   : > { %v1022_v27 = vpop.permute.xlu1 %1021  ;;  %v1119_v55 = vpop.permute.xlu2 %1118 }
 0x1b7   : > { %v1015_v32 = vadd.f32 %v1014_v29, %v1002_v31  ;;  %v1027_v33 = vsel %vm1025_vm1, %v1024_v7, %v1022_v27  ;;  %v1026_v13 = vsel %vm1025_vm1, %v1022_v27, %v1024_v7  ;;  %vm1218_vm1 = vmand %vm1090_vm5, %vm760_vm14 }
 0x1b8   : > { %v1030_v34 = vrot.slane %v1027_v33, 4 }
 0x1ba   : > { %v1031_v36 = vsel %vm355_vm6, %v1026_v13, %v1030_v34 }
 0x1bb   : > { %v1033_v41 = vsel %vm727_vm11, %v1031_v36, 0.0 }
 0x1bc   : > { %v1045_v38 = vmul.f32 %v1043_v35, %v1033_v41 }
 0x1be   : > { %v1046_v30 = vadd.f32 %v1045_v38, %v1015_v32  ;;  %v1053_v42 = vpop.permute.xlu1 %1052  ;;  %v1151_v50 = vpop.permute.xlu2 %1150 }
 0x1bf   : > { %v1058_v26 = vsel %vm1056_vm2, %v1055_v25, %v1053_v42  ;;  %v1057_v43 = vsel %vm1056_vm2, %v1053_v42, %v1055_v25  ;;  %vm1247_vm2 = vcmp.lt.s32.totalorder %v2004_v61, 38 }
 0x1c0   : > { %v1061_v44 = vrot.slane %v1058_v26, 4 }
 0x1c2   : > { %v1062_v46 = vsel %vm355_vm6, %v1057_v43, %v1061_v44 }
 0x1c3   : > { %v1064_v37 = vsel %vm760_vm14, %v1062_v46, 0.0 }
 0x1c4   : > { %v1076_v49 = vmul.f32 %v1074_v40, %v1064_v37 }
 0x1c6   : > { %v1077_v51 = vadd.f32 %v1076_v49, %v1046_v30  ;;  %v1084_v54 = vpop.permute.xlu1 %1083  ;;  %v1182_v56 = vpop.permute.xlu2 %1181 }
 0x1c7   : > { %v1089_v28 = vsel %vm1087_vm4, %v1086_v39, %v1084_v54  ;;  %v1088_v48 = vsel %vm1087_vm4, %v1084_v54, %v1086_v39  ;;  %v1295_v49 = vpop.permute.xlu0 %1294  ;;  %vm1280_vm4 = vcmp.lt.s32.totalorder %v2004_v61, 35 }
 0x1c8   : > { %v1094_v45 = vrot.slane %v1089_v28, 4 }
 0x1ca   : > { %v1095_v59 = vsel %vm355_vm6, %v1088_v48, %v1094_v45 }
 0x1cb   : > { %v1097_v60 = vsel %vm1091_vm8, %v1095_v59, 0.0  ;;  %vm1343_vm8 = vcmp.lt.s32.totalorder %v2004_v61, 29 }
 0x1cc   : > { %v1109_v62 = vmul.f32 %v1107_v57, %v1097_v60 }
 0x1ce   : > { %v1110_v0 = vadd.f32 %v1109_v62, %v1077_v51  ;;  %v1117_v1 = vpop.permute.xlu1 %1116  ;;  %v1214_v34 = vpop.permute.xlu2 %1213 }
 0x1cf   : > { %v1122_v2 = vsel %vm1120_vm9, %v1119_v55, %v1117_v1  ;;  %v1121_v7 = vsel %vm1120_vm9, %v1117_v1, %v1119_v55  ;;  %v1693_v55 = vld [vmem:[%s2484_s1] sm:$0xff] }
 0x1d0   : > { %v1126_v4 = vrot.slane %v1122_v2, 4  ;;  %vm1250_vm9 = vcmp.lt.s32.totalorder %v1693_v55, 10 }
 0x1d2   : > { %v1127_v47 = vsel %vm355_vm6, %v1121_v7, %v1126_v4 }
 0x1d3   : > { %v1129_v14 = vsel %vm1123_vm10, %v1127_v47, 0.0  ;;  %vm2403_vm10 = vmand %vm1250_vm9, %vm631_vm3  ;;  %vm1375_vm3 = vcmp.lt.s32.totalorder %v2004_v61, 26 }
 0x1d4   : > { %v1141_v15 = vmul.f32 %v1139_v11, %v1129_v14  ;;  %v1267_v14 = vperm.slane %v2182_v12, %v2037_v16 }
 0x1d6   : > { %v1142_v10 = vadd.f32 %v1141_v15, %v1110_v0  ;;  %v1149_v17 = vpop.permute.xlu1 %1148  ;;  %v1246_v43 = vpop.permute.xlu2 %1245 }
 0x1d7   : > { %v1154_v18 = vsel %vm1152_vm12, %v1151_v50, %v1149_v17  ;;  %v1153_v20 = vsel %vm1152_vm12, %v1149_v17, %v1151_v50  ;;  %vm2413_vm12 = vmand %vm1250_vm9, %vm663_vm7 }
 0x1d8   : > { %v1157_v19 = vrot.slane %v1154_v18, 4  ;;  %vm1346_vm7 = vmand %vm1250_vm9, %vm727_vm11 }
 0x1d9   : > { %vm1378_vm11 = vmand %vm1250_vm9, %vm760_vm14 }
 0x1da   : > { %v1158_v22 = vsel %vm355_vm6, %v1153_v20, %v1157_v19  ;;  %v1299_v20 = vperm.slane %v1295_v49, %v2037_v16 }
 0x1db   : > { %v1160_v52 = vsel %vm1090_vm5, %v1158_v22, 0.0  ;;  %vm1312_vm5 = vcmp.lt.s32.totalorder %v2004_v61, 32 }
 0x1dc   : > { %v1172_v9 = vmul.f32 %v1170_v21, %v1160_v52 }
 0x1de   : > { %v1173_v23 = vadd.f32 %v1172_v9, %v1142_v10  ;;  %v1180_v24 = vpop.permute.xlu1 %1179  ;;  %v1279_v46 = vpop.permute.xlu2 %1278  ;;  %v1330_v9 = vperm.slane %v2308_v53, %v2037_v16 }
 0x1df   : > { %v1185_v25 = vsel %vm1183_vm13, %v1182_v56, %v1180_v24  ;;  %v1184_v31 = vsel %vm1183_vm13, %v1180_v24, %v1182_v56 }
 0x1e0   : > { %v1189_v29 = vrot.slane %v1185_v25, 4 }
 0x1e2   : > { %v1190_v27 = vsel %vm355_vm6, %v1184_v31, %v1189_v29 }
 0x1e3   : > { %v1192_v32 = vsel %vm1186_vm15, %v1190_v27, 0.0 }
 0x1e4   : > { %v1204_v33 = vmul.f32 %v1202_v58, %v1192_v32 }
 0x1e6   : > { %v1205_v13 = vadd.f32 %v1204_v33, %v1173_v23  ;;  %v1212_v35 = vpop.permute.xlu1 %1211  ;;  %v1311_v51 = vpop.permute.xlu2 %1310 }
 0x1e7   : > { %v1217_v36 = vsel %vm1215_vm0, %v1214_v34, %v1212_v35  ;;  %v1216_v38 = vsel %vm1215_vm0, %v1212_v35, %v1214_v34 }
 0x1e8   : > { %v1221_v41 = vrot.slane %v1217_v36, 4 }
 0x1ea   : > { %v1222_v39 = vsel %vm355_vm6, %v1216_v38, %v1221_v41 }
 0x1eb   : > { %v1224_v30 = vsel %vm1218_vm1, %v1222_v39, 0.0 }
 0x1ec   : > { %v1236_v42 = vmul.f32 %v1234_v63, %v1224_v30 }
 0x1ee   : > { %v1237_v26 = vadd.f32 %v1236_v42, %v1205_v13  ;;  %v1244_v44 = vpop.permute.xlu1 %1243  ;;  %v1358_v52 = vpop.permute.xlu2 %1357 }
 0x1ef   : > { %v1249_v5 = vsel %vm1247_vm2, %v1246_v43, %v1244_v44  ;;  %v1248_v59 = vsel %vm1247_vm2, %v1244_v44, %v1246_v43  ;;  %v1362_v31 = vperm.slane %v1358_v52, %v2037_v16 }
 0x1f0   : > { %v1254_v54 = vrot.slane %v1249_v5, 4 }
 0x1f2   : > { %v1255_v0 = vsel %vm355_vm6, %v1248_v59, %v1254_v54 }
 0x1f3   : > { %v1257_v50 = vsel %vm2403_vm10, %v1255_v0, 0.0 }
 0x1f4   : > { %v1269_v21 = vmul.f32 %v1267_v14, %v1257_v50 }
 0x1f6   : > { %v1277_v40 = vpop.permute.xlu1 %1276  ;;  %v1270_v29 = vadd.f32 %v1269_v21, %v1237_v26  ;;  %v1413_v30 = vpop.permute.xlu2 %1412 }
 0x1f7   : > { %v1282_v8 = vsel %vm1280_vm4, %v1279_v46, %v1277_v40  ;;  %v1281_v2 = vsel %vm1280_vm4, %v1277_v40, %v1279_v46 }
 0x1f8   : > { %v1286_v57 = vrot.slane %v1282_v8, 4 }
 0x1fa   : > { %v1287_v7 = vsel %vm355_vm6, %v1281_v2, %v1286_v57 }
 0x1fb   : > { %v1289_v17 = vsel %vm2413_vm12, %v1287_v7, 0.0 }
 0x1fc   : > { %v1301_v23 = vmul.f32 %v1299_v20, %v1289_v17 }
 0x1fe   : > { %v1309_v37 = vpop.permute.xlu1 %1308  ;;  %v1302_v32 = vadd.f32 %v1301_v23, %v1270_v29 }
 0x1ff   : > { %v1314_v45 = vsel %vm1312_vm5, %v1311_v51, %v1309_v37  ;;  %v1313_v47 = vsel %vm1312_vm5, %v1309_v37, %v1311_v51 }
 0x200   : > { %v1317_v1 = vrot.slane %v1314_v45, 4 }
 0x202   : > { %v1318_v15 = vsel %vm355_vm6, %v1313_v47, %v1317_v1 }
 0x203   : > { %v1320_v56 = vsel %vm1250_vm9, %v1318_v15, 0.0 }
 0x204   : > { %v1332_v58 = vmul.f32 %v1330_v9, %v1320_v56 }
 0x206   : > { %v1342_v28 = vpop.permute.xlu1 %1341  ;;  %v1333_v53 = vadd.f32 %v1332_v58, %v1302_v32 }
 0x207   : > { %v1340_v48 = vpop.permute.xlu0 %1339 }
 0x208   : > { %v1345_v60 = vsel %vm1343_vm8, %v1342_v28, %v1340_v48  ;;  %v1344_v18 = vsel %vm1343_vm8, %v1340_v48, %v1342_v28 }
 0x209   : > { %v1349_v11 = vrot.slane %v1345_v60, 4 }
 0x20b   : > { %v1350_v22 = vsel %vm355_vm6, %v1344_v18, %v1349_v11  ;;  %v1465_v11 = vpop.permute.xlu2 %1464 }
 0x20c   : > { %v1352_v25 = vsel %vm1346_vm7, %v1350_v22, 0.0 }
 0x20d   : > { %v1364_v33 = vmul.f32 %v1362_v31, %v1352_v25 }
 0x20e   : > { %v1374_v10 = vpop.permute.xlu1 %1373 }
 0x20f   : > { %v1372_v19 = vpop.permute.xlu0 %1371  ;;  %v1365_v38 = vadd.f32 %v1364_v33, %v1333_v53 }
 0x210   : > { %v1377_v12 = vsel %vm1375_vm3, %v1374_v10, %v1372_v19  ;;  %v1376_v27 = vsel %vm1375_vm3, %v1372_v19, %v1374_v10 }
 0x211   : > { %v1381_v24 = vrot.slane %v1377_v12, 4 }
 0x213   : > { %v1382_v34 = vsel %vm355_vm6, %v1376_v27, %v1381_v24 }
 0x214   : > { %v1384_v41 = vsel %vm1378_vm11, %v1382_v34, 0.0 }
 0x216   : > { %v1402_v36 = vpop.permute.xlu1 %1401 }
 0x217   : > { %v1390_v13 = vpop.permute.xlu0 %1389  ;;  %v1406_v39 = vperm.slane %v1402_v36, %v2037_v16 }
 0x218   : > { %v1394_v35 = vperm.slane %v1390_v13, %v2037_v16 }
 0x21a   : > { %v1396_v63 = vmul.f32 %v1394_v35, %v1384_v41 }
 0x21c   : > { %v1397_v61 = vadd.f32 %v1396_v63, %v1365_v38 }
 0x21e   : > { %v1408_v42 = vadd.f32 %v1406_v39, %v1397_v61  ;;  %v1448_v0 = vpop.permute.xlu1 %1447 }
 0x21f   : > { %v1431_v5 = vpop.permute.xlu0 %1430 }
 0x220   : > { %v1450_v26 = vperm.slane %v1408_v42, 2  ;;  %v1451_v44 = vperm.slane %v1408_v42, 6  ;;  %v1416_v43 = vperm.slane %v1408_v42, 0  ;;  %v1417_v40 = vperm.slane %v1408_v42, 4 }
 0x221   : > { %v1433_v6 = vperm.slane %v1408_v42, 1  ;;  %v1434_v46 = vperm.slane %v1408_v42, 5  ;;  %v1467_v37 = vperm.slane %v1408_v42, 3  ;;  %v1468_v49 = vperm.slane %v1408_v42, 7 }
 0x222   : > { %v1420_v8 = vperm.slane %v1416_v43, 0  ;;  %v1421_v51 = vperm.slane %v1417_v40, 0  ;;  %v1454_v54 = vperm.slane %v1450_v26, 2  ;;  %v1455_v28 = vperm.slane %v1451_v44, 2 }
 0x223   : > { %v1437_v55 = vperm.slane %v1433_v6, 1  ;;  %v1438_v45 = vperm.slane %v1434_v46, 1  ;;  %v1471_v60 = vperm.slane %v1467_v37, 3  ;;  %v1472_v62 = vperm.slane %v1468_v49, 3 }
 0x224   : > { %v1422_v16 = vmul.f32 %v1420_v8, %v1413_v30  ;;  %v1423_v48 = vmul.f32 %v1421_v51, %v1413_v30  ;;  %v1456_v1 = vmul.f32 %v1454_v54, %v1448_v0  ;;  %v1457_v2 = vmul.f32 %v1455_v28, %v1448_v0 }
 0x225   : > { %v1439_v57 = vmul.f32 %v1437_v55, %v1431_v5  ;;  %v1440_v59 = vmul.f32 %v1438_v45, %v1431_v5  ;;  %v1473_v14 = vmul.f32 %v1471_v60, %v1465_v11  ;;  %v1474_v15 = vmul.f32 %v1472_v62, %v1465_v11 }
 0x227   : > { %v1441_v4 = vadd.f32 %v1439_v57, %v1422_v16  ;;  %v1442_v7 = vadd.f32 %v1440_v59, %v1423_v48  ;;  %v1481_v18 = vpop.permute.xlu0 %1480 }
 0x229   : > { %v1458_v50 = vadd.f32 %v1456_v1, %v1441_v4  ;;  %v1459_v47 = vadd.f32 %v1457_v2, %v1442_v7 }
 0x22b   : > { %v1475_v10 = vadd.f32 %v1473_v14, %v1458_v50  ;;  %v1476_v17 = vadd.f32 %v1474_v15, %v1459_v47 }
 0x22d   : > { %v1484_v19 = vadd.f32 %v1481_v18, %v1476_v17  ;;  %v1483_v20 = vadd.f32 %v1481_v18, %v1475_v10 }
 0x22f   : > { %v1487_v21 = vrot.slane %v1484_v19, 4 }
 0x231   : > { %v1488_v22 = vsel %vm355_vm6, %v1483_v20, %v1487_v21 }
 0x232   : > { %v1490_v12 = vmul.f32 %v1488_v22, %v1901_v3 }
 0x234   : > { %1491 = vst [vmem:[%s325_s17] sm:$0xff] %v1490_v12 }
 0x235   : > { %1721 = shalt.err (!%p1718_p3)
}
 0x236   : > { %1617 = dma.vmem_to_hbm [thread:$0]  (%p1880_p5), %s1507_s21, 128, %s1509_s22, %s1493_s13  }
 0x237 PF: > { %p1623_p4 = scmp.ge.s32.totalorder %s1756_s12, 2  ;;  %s1520_s26 = sand.u32 1, %s1744_s30  }
 0x238   : > { %s1521_s16 = scalar_lea.sflag [#allocation3], %s1520_s26 }
 0x239   : > { %p1620_p7 = pnand %p1623_p4, %p1884_p6 }
 0x23b   : > { %p1621_p8 = pneg %p1620_p7 }
 0x23d   : > { %1739 = dma.done.wait (%p1621_p8), %s1521_s16, 128  }
 0x23e   : > { %1741 = vsyncadd (%p1621_p8), %s1521_s16, 4294967168  ;;  %p19_p9 = scmp.ge.s32.totalorder %s1867_s15, 4   ;;  %s2503_s30 = smov %s1748_s10 }
 0x23f   : > { %s2504_s10 = smov %s1752_s11  ;;  %s2505_s11 = smov %s1878_s18 }
 0x240   : > { %s2506_s12 = smov %s1867_s15  ;;  %21 = sbr.rel (!%p19_p9) target bundleno = 3 (0x3), region = 126 }
 0x245   :  { %1527 = vsyncpa [#allocation3], 1 }
 0x246   :  { %1529 = vsyncpa [#allocation3 + $0x1], 1 }

</bundles_post_ra>
